<compile_context>
chip_gen: v6e
topology: v6e:2x2x1
jax: 0.10.0
libtpu: 0.0.40
codegen_flags: <defaults>
</compile_context>

<pallas_src>
import numpy as np
import jax
import jax.numpy as jnp
from jax import lax
from jax.experimental import pallas as pl
from jax.experimental.pallas import tpu as pltpu

EPS = 1e-5


# --------------------------------------------------------------------------
# VMEM budgeting helpers
# --------------------------------------------------------------------------
def _round_up(x, m):
    return (x + m - 1) // m * m


def _padded_vmem_bytes(shape, dtype):
    """Physical VMEM footprint: minor two dims pad to (8 sublanes, 128 lanes)."""
    if len(shape) == 1:
        lead, s, l = 1, 1, shape[0]
    else:
        *lead_dims, s, l = shape
        lead = int(np.prod(lead_dims)) if lead_dims else 1
    return lead * _round_up(s, 8) * _round_up(l, 128) * np.dtype(dtype).itemsize


def _vmem_limit_bytes():
    """Scoped-VMEM limit from the actual chip instead of a hard-coded 32 MiB."""
    cap = 64 * 1024 * 1024                       # safe fallback (v7x-sized)
    try:
        info = pltpu.get_tpu_info()
        cap = int(getattr(info, "vmem_capacity_bytes", cap) or cap)
    except Exception:
        pass
    return min(cap * 3 // 4, 112 * 1024 * 1024)


def _choose_row_tile(rows, footprint_fn, budget, min_rows):
    """Largest divisor of `rows` whose padded per-step footprint fits `budget`,
    preferring >=2 grid steps along the row axis (pipelining / megacore)."""
    divs = [d for d in range(rows, 0, -1) if rows % d == 0 and d >= min_rows]
    if not divs:
        divs = [rows]
    fits = [d for d in divs if footprint_fn(d) <= budget]
    pool = fits if fits else divs[-1:]
    multi = [d for d in pool if rows // d >= 2]
    return multi[0] if multi else pool[0]


# --------------------------------------------------------------------------
# Kernels
# --------------------------------------------------------------------------
def _make_stride1_kernel(H, W, in_ch, Cmid, Ctot, k, TH, mm_dtype, sc_dtype):
    """Fused stride-1 block on a TH-row tile: channel split, 1x1 conv -> ReLU,
    DW kxk, 1x1 conv -> ReLU, passthrough + concat + channel shuffle (the last
    three baked into scattered weight columns)."""
    p = k // 2
    Wp = W + 2 * p
    TS = TH + 2 * p
    nT = H // TH

    def kernel(x_ref, w1_ref, b1_ref, dww_ref, w2p_ref, s1p_ref, b3p_ref,
               o_ref, pad_ref):
        t = pl.program_id(1)
        row0 = pl.multiple_of(t * TH, TH)
        w1 = w1_ref[...]
        b1 = b1_ref[...]

        def conv1(x2rows):                               # (n, W, in_ch) -> (n, W, Cmid)
            n = x2rows.shape[0]
            h = jnp.dot(x2rows.reshape(n * W, in_ch).astype(mm_dtype), w1,
                        preferred_element_type=jnp.float32) + b1
            return jnp.maximum(h, 0.0).reshape(n, W, Cmid)

        # W-halo columns of the scratch (corners included); interior is fully
        # overwritten below, so only the thin border is zeroed.
        pad_ref[:, 0:p, :] = jnp.zeros((TS, p, Cmid), sc_dtype)
        pad_ref[:, p + W:Wp, :] = jnp.zeros((TS, p, Cmid), sc_dtype)

        # main TH rows of this tile.
        xm = x_ref[pl.ds(row0, TH), :, :].astype(jnp.float32)
        x1 = xm[:, :, :in_ch]                            # passthrough branch
        pad_ref[p:p + TH, p:p + W, :] = conv1(xm[:, :, in_ch:]).astype(sc_dtype)

        # H-halo rows (p each side): recompute from clamped neighbour rows and
        # select zeros at the feature-map border.
        lo = jnp.maximum(row0 - p, 0)
        xt = x_ref[pl.ds(lo, p), :, :].astype(jnp.float32)
        pad_ref[0:p, p:p + W, :] = jnp.where(
            t > 0, conv1(xt[:, :, in_ch:]), 0.0).astype(sc_dtype)
        hi = jnp.minimum(row0 + TH, H - p)
        xb = x_ref[pl.ds(hi, p), :, :].astype(jnp.float32)
        pad_ref[p + TH:TS, p:p + W, :] = jnp.where(
            t < nT - 1, conv1(xb[:, :, in_ch:]), 0.0).astype(sc_dtype)

        # depthwise k x k conv on the tile (f32 accumulation).
        acc = jnp.zeros((TH, W, Cmid), jnp.float32)
        for dh in range(k):
            for dw in range(k):
                acc = acc + pad_ref[dh:dh + TH, dw:dw + W, :] * dww_ref[dh, dw, :]
        acc = acc.reshape(TH * W, Cmid)

        # final 1x1 conv; concat + channel shuffle baked into scattered weight
        # columns (x2 branch) and a 0-1 selection matmul (x1 passthrough,
        # which is NOT ReLU'd per the torch forward).
        y2 = jnp.maximum(
            jnp.dot(acc.astype(mm_dtype), w2p_ref[...],
                    preferred_element_type=jnp.float32) + b3p_ref[...], 0.0)
        y1 = jnp.dot(x1.reshape(TH * W, in_ch).astype(mm_dtype), s1p_ref[...],
                     preferred_element_type=jnp.float32)
        # TODO(synk): lane-dense repack of the (TH*W, Ctot) result before the
        #             store for small Ctot (masked vst otherwise).
        o_ref[...] = (y1 + y2).reshape(TH, W, Ctot).astype(o_ref.dtype)

    return kernel, (TS, Wp)


def _make_stride2_kernel(H, W, Cin, Cmid, C2, k, THo, mm_dtype, sc_dtype):
    """Fused stride-2 block on a THo-output-row tile: both branches share one
    input read; DW convs read the padded scratches at stride-2 positions; the
    final 1x1 convs write the channel-shuffled output directly."""
    p = k // 2
    Wp = W + 2 * p
    Wo = W // 2
    Ho = H // 2
    TS = 2 * THo + 2 * p
    nT = Ho // THo

    def kernel(x_ref, w1_ref, b1_ref, dww1_ref, dww2_ref, w2p_ref, w3p_ref,
               bc_ref, o_ref, pad1_ref, pad2_ref):
        t = pl.program_id(1)
        o0 = pl.multiple_of(t * THo, THo)
        r0 = 2 * o0
        w1 = w1_ref[...]
        b1 = b1_ref[...]

        def conv1(xrows):                                # (n, W, Cin) -> (n, W, Cmid)
            n = xrows.shape[0]
            h = jnp.dot(xrows.reshape(n * W, Cin).astype(mm_dtype), w1,
                        preferred_element_type=jnp.float32) + b1
            return jnp.maximum(h, 0.0).reshape(n, W, Cmid)

        # W-halo columns of both scratches.
        pad1_ref[:, 0:p, :] = jnp.zeros((TS, p, Cin), sc_dtype)
        pad1_ref[:, p + W:Wp, :] = jnp.zeros((TS, p, Cin), sc_dtype)
        pad2_ref[:, 0:p, :] = jnp.zeros((TS, p, Cmid), sc_dtype)
        pad2_ref[:, p + W:Wp, :] = jnp.zeros((TS, p, Cmid), sc_dtype)

        # middle chunk: 2*THo input rows, always fully inside the feature map.
        xm = x_ref[pl.ds(r0, 2 * THo), :, :].astype(jnp.float32)
        pad1_ref[p:p + 2 * THo, p:p + W, :] = xm.astype(sc_dtype)
        pad2_ref[p:p + 2 * THo, p:p + W, :] = conv1(xm).astype(sc_dtype)

        # top / bottom H-halo rows (p each), zero-selected at the borders.
        lo = jnp.maximum(r0 - p, 0)
        xt = x_ref[pl.ds(lo, p), :, :].astype(jnp.float32)
        pad1_ref[0:p, p:p + W, :] = jnp.where(t > 0, xt, 0.0).astype(sc_dtype)
        pad2_ref[0:p, p:p + W, :] = jnp.where(t > 0, conv1(xt), 0.0).astype(sc_dtype)
        hi = jnp.minimum(r0 + 2 * THo, H - p)
        xb = x_ref[pl.ds(hi, p), :, :].astype(jnp.float32)
        pad1_ref[p + 2 * THo:TS, p:p + W, :] = jnp.where(
            t < nT - 1, xb, 0.0).astype(sc_dtype)
        pad2_ref[p + 2 * THo:TS, p:p + W, :] = jnp.where(
            t < nT - 1, conv1(xb), 0.0).astype(sc_dtype)

        # depthwise k x k convs, evaluated directly at stride-2 output
        # positions (f32 accumulation).
        # TODO(synk): de-interleave even/odd W planes to avoid per-tap
        #             sublane-strided reads at production widths.
        acc1 = jnp.zeros((THo, Wo, Cin), jnp.float32)
        acc2 = jnp.zeros((THo, Wo, Cmid), jnp.float32)
        for dh in range(k):
            for dw in range(k):
                acc1 = acc1 + (pad1_ref[pl.ds(dh, THo, 2), pl.ds(dw, Wo, 2), :]
                               * dww2_ref[dh, dw, :])
                acc2 = acc2 + (pad2_ref[pl.ds(dh, THo, 2), pl.ds(dw, Wo, 2), :]
                               * dww1_ref[dh, dw, :])
        h1 = acc1.reshape(THo * Wo, Cin)
        h2 = acc2.reshape(THo * Wo, Cmid)

        # final 1x1 convs; concat + shuffle baked into zero-interleaved weight
        # columns (branch-1 -> even channels, branch-2 -> odd); both branches
        # end with ReLU so it applies to the combined sum.
        y = (jnp.dot(h1.astype(mm_dtype), w3p_ref[...],
                     preferred_element_type=jnp.float32)
             + jnp.dot(h2.astype(mm_dtype), w2p_ref[...],
                       preferred_element_type=jnp.float32)
             + bc_ref[...])
        o_ref[...] = jnp.maximum(y, 0.0).reshape(THo, Wo, C2).astype(o_ref.dtype)

    return kernel, (TS, Wp, Ho, Wo)


# --------------------------------------------------------------------------
# pallas_call wrappers (grid over (batch, row tiles); input resident per batch)
# --------------------------------------------------------------------------
def _spec_full(shape):
    n = len(shape)
    return pl.BlockSpec(shape, lambda b, t, _n=n: (0,) * _n)


def _run_stride1(x, w1s, b1, dww, w2p, s1p, b3p, *, in_ch, k, mm_dtype, sc_dtype):
    B, H, W, Cx = x.shape
    Cmid = w1s.shape[1]
    Ctot = w2p.shape[1]
    p = k // 2
    Wp = W + 2 * p
    budget = _vmem_limit_bytes()

    def footprint(TH):
        TS = TH + 2 * p
        return (2 * _padded_vmem_bytes((H, W, Cx), x.dtype)          # resident input (dbl-buf)
                + 2 * _padded_vmem_bytes((TH, W, Ctot), x.dtype)     # output block (dbl-buf)
                + _padded_vmem_bytes((TS, Wp, Cmid), sc_dtype)       # DW scratch
                + _padded_vmem_bytes((TH * W, Cmid), jnp.float32)    # live DW accumulator
                + 2 * sum(_padded_vmem_bytes(a.shape, a.dtype)
                          for a in (w1s, b1, dww, w2p, s1p, b3p)))

    TH = _choose_row_tile(H, footprint, budget * 6 // 10, min_rows=max(p, 1))
    nT = H // TH
    kernel, (TS, Wp) = _make_stride1_kernel(H, W, in_ch, Cmid, Ctot, k, TH,
                                            mm_dtype, sc_dtype)
    return pl.pallas_call(
        kernel,
        out_shape=jax.ShapeDtypeStruct((B, H, W, Ctot), x.dtype),
        grid_spec=pltpu.PrefetchScalarGridSpec(
            num_scalar_prefetch=0,
            grid=(B, nT),
            in_specs=[
                pl.BlockSpec((None, H, W, Cx), lambda b, t: (b, 0, 0, 0)),
                _spec_full(w1s.shape),       # TODO(synk): pl.Buffered(1) once verified
                _spec_full(b1.shape),
                _spec_full(dww.shape),
                _spec_full(w2p.shape),
                _spec_full(s1p.shape),
                _spec_full(b3p.shape),
            ],
            out_specs=pl.BlockSpec((None, TH, W, Ctot), lambda b, t: (b, t, 0, 0)),
            scratch_shapes=[pltpu.VMEM((TS, Wp, Cmid), sc_dtype)],
        ),
        compiler_params=pltpu.CompilerParams(
            dimension_semantics=("parallel", "parallel"),
            vmem_limit_bytes=budget),
    )(x, w1s, b1, dww, w2p, s1p, b3p)


def _run_stride2(x, w1s, b1, dww1, dww2, w2p, w3p, bcat, *, k, mm_dtype, sc_dtype):
    B, H, W, Cin = x.shape
    assert H % 2 == 0 and W % 2 == 0, "stride-2 kernel assumes even H and W"
    Cmid = w1s.shape[1]
    C2 = w2p.shape[1]
    p = k // 2
    Ho, Wo = H // 2, W // 2
    Wp = W + 2 * p
    budget = _vmem_limit_bytes()

    def footprint(THo):
        TS = 2 * THo + 2 * p
        return (2 * _padded_vmem_bytes((H, W, Cin), x.dtype)
                + 2 * _padded_vmem_bytes((THo, Wo, C2), x.dtype)
                + _padded_vmem_bytes((TS, Wp, Cin), sc_dtype)
                + _padded_vmem_bytes((TS, Wp, Cmid), sc_dtype)
                + _padded_vmem_bytes((THo * Wo, Cin), jnp.float32)
                + _padded_vmem_bytes((THo * Wo, Cmid), jnp.float32)
                + 2 * sum(_padded_vmem_bytes(a.shape, a.dtype)
                          for a in (w1s, b1, dww1, dww2, w2p, w3p, bcat)))

    THo = _choose_row_tile(Ho, footprint, budget * 6 // 10, min_rows=max(p, 1))
    nT = Ho // THo
    kernel, (TS, _, _, _) = _make_stride2_kernel(H, W, Cin, Cmid, C2, k, THo,
                                                 mm_dtype, sc_dtype)
    return pl.pallas_call(
        kernel,
        out_shape=jax.ShapeDtypeStruct((B, Ho, Wo, C2), x.dtype),
        grid_spec=pltpu.PrefetchScalarGridSpec(
            num_scalar_prefetch=0,
            grid=(B, nT),
            in_specs=[
                pl.BlockSpec((None, H, W, Cin), lambda b, t: (b, 0, 0, 0)),
                _spec_full(w1s.shape),
                _spec_full(b1.shape),
                _spec_full(dww1.shape),
                _spec_full(dww2.shape),
                _spec_full(w2p.shape),
                _spec_full(w3p.shape),
                _spec_full(bcat.shape),
            ],
            out_specs=pl.BlockSpec((None, THo, Wo, C2), lambda b, t: (b, t, 0, 0)),
            scratch_shapes=[pltpu.VMEM((TS, Wp, Cin), sc_dtype),
                            pltpu.VMEM((TS, Wp, Cmid), sc_dtype)],
        ),
        compiler_params=pltpu.CompilerParams(
            dimension_semantics=("parallel", "parallel"),
            vmem_limit_bytes=budget),
    )(x, w1s, b1, dww1, dww2, w2p, w3p, bcat)


# --------------------------------------------------------------------------
# Choice_Block forward (BN/weight folding + shuffle-scatter construction)
# --------------------------------------------------------------------------
def _fold_bn(bn):
    g, b, m, v = bn
    scale = g / jnp.sqrt(v + EPS)
    bias = b - m * scale
    return scale, bias


def _shuffle_perm(c_total):
    """Output channel j of shuffle_channels(cat, groups=2) reads cat channel perm[j]."""
    assert c_total % 2 == 0, "channel shuffle with groups=2 needs an even channel count"
    half = c_total // 2
    return np.array([(j % 2) * half + j // 2 for j in range(c_total)], np.int64)


def choice_block_forward_nhwc(x, params, *, matmul_dtype=jnp.float32,
                              scratch_dtype=None):
    """NHWC Choice_Block forward (eval-mode BatchNorm folded into weights).
    Keep activations NHWC across consecutive blocks; only convert to NCHW at
    network boundaries.  bfloat16 matmul/scratch dtypes are recommended on all
    TPU generations (f32 accumulation is kept either way)."""
    cfg = params["cfg"]
    in_ch, k, stride = cfg["in_channels"], cfg["k_size"], cfg["stride"]
    assert k % 2 == 1, "odd kernel sizes only"
    sc_dtype = matmul_dtype if scratch_dtype is None else scratch_dtype

    # torch layouts -> matmul layouts: 1x1 OIHW -> (I, O); depthwise (C,1,k,k) -> (k,k,C)
    w1 = jnp.transpose(params["conv1"][:, :, 0, 0], (1, 0))
    dw1 = jnp.transpose(params["DW_conv1"][:, 0, :, :], (1, 2, 0))
    w2 = jnp.transpose(params["conv2"][:, :, 0, 0], (1, 0))
    s1, b1 = _fold_bn(params["bn1"])
    s2, b2 = _fold_bn(params["bn2"])
    s3, b3 = _fold_bn(params["bn3"])
    w1s = w1 * s1[None, :]
    dw1s = dw1 * s2[None, None, :]
    w2s = w2 * s3[None, :]
    b3e = b2 @ w2s + b3                  # bn2 bias folded through conv2 (no ReLU between)
    Cmid, Cout = w1.shape[1], w2.shape[1]

    if stride == 1:
        assert x.shape[-1] == 2 * in_ch
        c_total = in_ch + Cout
        perm = _shuffle_perm(c_total)
        x1_cols = np.nonzero(perm < in_ch)[0]
        x2_cols = np.nonzero(perm >= in_ch)[0]
        # scatter cat + shuffle into the final stage:
        #   out[:, j] = x1[:, perm[j]]                     if perm[j] <  in_ch
        #   out[:, j] = relu(conv2(...) + b3e)[perm[j]-in_ch]  otherwise
        w2p = jnp.zeros((Cmid, c_total), jnp.float32).at[:, x2_cols].set(
            w2s[:, perm[x2_cols] - in_ch])
        b3p = jnp.zeros((c_total,), jnp.float32).at[x2_cols].set(
            b3e[perm[x2_cols] - in_ch])
        s1p = jnp.zeros((in_ch, c_total), jnp.float32).at[perm[x1_cols], x1_cols].set(1.0)
        y = _run_stride1(
            x, w1s.astype(matmul_dtype), b1[None, :], dw1s,
            w2p.astype(matmul_dtype), s1p.astype(matmul_dtype), b3p[None, :],
            in_ch=in_ch, k=k, mm_dtype=matmul_dtype, sc_dtype=sc_dtype)
    else:
        assert x.shape[-1] == in_ch
        dw2 = jnp.transpose(params["DW_conv2"][:, 0, :, :], (1, 2, 0))
        w3 = jnp.transpose(params["conv3"][:, :, 0, 0], (1, 0))
        s4, b4 = _fold_bn(params["bn4"])
        s5, b5 = _fold_bn(params["bn5"])
        dw2s = dw2 * s4[None, None, :]
        w3s = w3 * s5[None, :]
        b5e = b4 @ w3s + b5
        c_total = 2 * Cout
        # concat + shuffle(groups=2): branch-1 -> even channels, branch-2 -> odd.
        w3p = jnp.zeros((in_ch, c_total), jnp.float32).at[:, 0::2].set(w3s)
        w2p = jnp.zeros((Cmid, c_total), jnp.float32).at[:, 1::2].set(w2s)
        bcat = jnp.zeros((c_total,), jnp.float32).at[0::2].set(b5e).at[1::2].set(b3e)
        y = _run_stride2(
            x, w1s.astype(matmul_dtype), b1[None, :], dw1s, dw2s,
            w2p.astype(matmul_dtype), w3p.astype(matmul_dtype), bcat[None, :],
            k=k, mm_dtype=matmul_dtype, sc_dtype=sc_dtype)
    return y


def choice_block_forward(x_nchw, params, **kw):
    """NCHW (torch-layout) wrapper.  For stacks of blocks, keep activations in
    NHWC via choice_block_forward_nhwc and convert only at the boundaries."""
    x = jnp.transpose(x_nchw, (0, 2, 3, 1))
    y = choice_block_forward_nhwc(x, params, **kw)
    return jnp.transpose(y, (0, 3, 1, 2))


# --------------------------------------------------------------------------
# Deterministic parameter init (shapes follow the torch module __init__)
# --------------------------------------------------------------------------
def init_choice_block_params(key, in_ch, mid_ch, out_ch, k, stride):
    ks = iter(jax.random.split(key, 32))

    def conv(shape):
        return jax.random.normal(next(ks), shape, jnp.float32) * 0.1

    def bn(c):
        g = jax.random.uniform(next(ks), (c,), jnp.float32, 0.5, 1.5)
        b = jax.random.normal(next(ks), (c,), jnp.float32) * 0.1
        m = jax.random.normal(next(ks), (c,), jnp.float32) * 0.1
        v = jax.random.uniform(next(ks), (c,), jnp.float32, 0.5, 1.5)
        return (g, b, m, v)

    p = {
        "cfg": dict(in_channels=in_ch, mid_channels=mid_ch,
                    out_channels=out_ch, k_size=k, stride=stride),
        "conv1": conv((mid_ch, in_ch, 1, 1)), "bn1": bn(mid_ch),
        "DW_conv1": conv((mid_ch, 1, k, k)), "bn2": bn(mid_ch),
        "conv2": conv((out_ch, mid_ch, 1, 1)), "bn3": bn(out_ch),
    }
    if stride == 2:
        p["DW_conv2"] = conv((in_ch, 1, k, k)); p["bn4"] = bn(in_ch)
        p["conv3"] = conv((out_ch, in_ch, 1, 1)); p["bn5"] = bn(out_ch)
    return p


# --------------------------------------------------------------------------
# Pure-JAX reference (mirrors the torch forward, eval-mode BN) for checking
# --------------------------------------------------------------------------
def reference_forward(x, params):
    cfg = params["cfg"]
    in_ch, k, stride = cfg["in_channels"], cfg["k_size"], cfg["stride"]
    pad = k // 2

    def conv1x1(x, w):
        return lax.conv_general_dilated(x, w, (1, 1), "VALID",
                                        dimension_numbers=("NCHW", "OIHW", "NCHW"))

    def dwconv(x, w, s):
        return lax.conv_general_dilated(x, w, (s, s), [(pad, pad), (pad, pad)],
                                        dimension_numbers=("NCHW", "OIHW", "NCHW"),
                                        feature_group_count=x.shape[1])

    def bn(x, bnp):
        g, b, m, v = bnp
        return ((x - m[None, :, None, None]) / jnp.sqrt(v[None, :, None, None] + EPS)
                * g[None, :, None, None] + b[None, :, None, None])

    if stride == 1:
        x1, x2 = x[:, :in_ch], x[:, in_ch:]
    else:
        x1 = bn(dwconv(x, params["DW_conv2"], 2), params["bn4"])
        x1 = jnp.maximum(bn(conv1x1(x1, params["conv3"]), params["bn5"]), 0.0)
        x2 = x
    x2 = jnp.maximum(bn(conv1x1(x2, params["conv1"]), params["bn1"]), 0.0)
    x2 = bn(dwconv(x2, params["DW_conv1"], stride), params["bn2"])
    x2 = jnp.maximum(bn(conv1x1(x2, params["conv2"]), params["bn3"]), 0.0)
    x3 = jnp.concatenate([x1, x2], axis=1)
    B, C, H, W = x3.shape
    x3 = x3.reshape(B, 2, C // 2, H, W)
    return jnp.transpose(x3, (0, 2, 1, 3, 4)).reshape(B, C, H, W)


# --------------------------------------------------------------------------
if __name__ == "__main__":
    key = jax.random.PRNGKey(0)
    k_p1, k_p2, k_p3, k_x1, k_x2, k_x3 = jax.random.split(key, 6)

    # stride=1 block (channel-split path): input has 2*in_channels channels.
    p1 = init_choice_block_params(k_p1, in_ch=4, mid_ch=8, out_ch=4, k=3, stride=1)
    x1 = jax.random.normal(k_x1, (2, 8, 16, 16), jnp.float32)
    y1 = jax.block_until_ready(choice_block_forward(x1, p1))
    r1 = np.asarray(reference_forward(x1, p1))
    np.testing.assert_allclose(np.asarray(y1), r1, atol=1e-4, rtol=1e-4)
    assert y1.shape == (2, 8, 16, 16)

    # stride=2 block (fused downsampling path): input has in_channels channels.
    p2 = init_choice_block_params(k_p2, in_ch=4, mid_ch=8, out_ch=8, k=3, stride=2)
    x2 = jax.random.normal(k_x2, (2, 4, 16, 16), jnp.float32)
    y2 = jax.block_until_ready(choice_block_forward(x2, p2))
    r2 = np.asarray(reference_forward(x2, p2))
    np.testing.assert_allclose(np.asarray(y2), r2, atol=1e-4, rtol=1e-4)
    assert y2.shape == (2, 16, 8, 8)

    # stride=1 block with in_channels != out_channels (general shuffle scatter).
    p3 = init_choice_block_params(k_p3, in_ch=4, mid_ch=8, out_ch=6, k=3, stride=1)
    x3 = jax.random.normal(k_x3, (1, 8, 16, 16), jnp.float32)
    y3 = jax.block_until_ready(choice_block_forward(x3, p3))
    r3 = np.asarray(reference_forward(x3, p3))
    np.testing.assert_allclose(np.asarray(y3), r3, atol=1e-4, rtol=1e-4)
    assert y3.shape == (1, 10, 16, 16)

    # bf16 MXU + bf16 DW-scratch fast path (recommended on v5e/v6e/v7x);
    # f32 accumulation, looser tolerance against the f32 reference.
    y1b = jax.block_until_ready(
        choice_block_forward(x1, p1, matmul_dtype=jnp.bfloat16))
    np.testing.assert_allclose(np.asarray(y1b), r1, atol=1e-1, rtol=1e-1)
    y2b = jax.block_until_ready(
        choice_block_forward(x2, p2, matmul_dtype=jnp.bfloat16))
    np.testing.assert_allclose(np.asarray(y2b), r2, atol=1e-1, rtol=1e-1)

    print("KERNEL_OK")
</pallas_src>

<mosaic_0001>
module attributes {stable_mosaic.version = 11 : i64} {
  func.func @kernel(%arg0: i32, %arg1: i32, %arg2: memref<1x16x16x8xf32, #tpu.memory_space<vmem>>, %arg3: memref<4x8xf32, #tpu.memory_space<vmem>>, %arg4: memref<1x8xf32, #tpu.memory_space<vmem>>, %arg5: memref<3x3x8xf32, #tpu.memory_space<vmem>>, %arg6: memref<8x8xf32, #tpu.memory_space<vmem>>, %arg7: memref<4x8xf32, #tpu.memory_space<vmem>>, %arg8: memref<1x8xf32, #tpu.memory_space<vmem>>, %arg9: memref<1x8x16x8xf32, #tpu.memory_space<vmem>>, %arg10: memref<10x18x8xf32, #tpu.memory_space<vmem>>) attributes {dimension_semantics = [#tpu.dimension_semantics<parallel>, #tpu.dimension_semantics<parallel>], iteration_bounds = array<i64: 2, 2>, scalar_prefetch = 0 : i64, scratch_operands = 1 : i64, tpu.core_type = #tpu.core_type<tc>, window_params = [{transform_indices = @transform_0, window_bounds = array<i64: 1, 16, 16, 8>}, {pipeline_mode = #tpu.pipeline_mode<synchronous>, transform_indices = @transform_1, window_bounds = array<i64: 4, 8>}, {pipeline_mode = #tpu.pipeline_mode<synchronous>, transform_indices = @transform_2, window_bounds = array<i64: 1, 8>}, {pipeline_mode = #tpu.pipeline_mode<synchronous>, transform_indices = @transform_3, window_bounds = array<i64: 3, 3, 8>}, {pipeline_mode = #tpu.pipeline_mode<synchronous>, transform_indices = @transform_4, window_bounds = array<i64: 8, 8>}, {pipeline_mode = #tpu.pipeline_mode<synchronous>, transform_indices = @transform_5, window_bounds = array<i64: 4, 8>}, {pipeline_mode = #tpu.pipeline_mode<synchronous>, transform_indices = @transform_6, window_bounds = array<i64: 1, 8>}, {transform_indices = @transform_7, window_bounds = array<i64: 1, 8, 16, 8>}]} {
    %c8_i32 = arith.constant 8 : i32
    %0 = arith.muli %arg1, %c8_i32 : i32
    %1 = tpu.assume_multiple %0, 8 : i32
    %c0 = arith.constant 0 : index
    %c0_0 = arith.constant 0 : index
    %2 = vector.load %arg3[%c0, %c0_0] : memref<4x8xf32, #tpu.memory_space<vmem>>, vector<4x8xf32>
    %c0_1 = arith.constant 0 : index
    %c0_2 = arith.constant 0 : index
    %3 = vector.load %arg4[%c0_1, %c0_2] : memref<1x8xf32, #tpu.memory_space<vmem>>, vector<1x8xf32>
    %cst = arith.constant 0.000000e+00 : f32
    %4 = vector.broadcast %cst : f32 to vector<10x1x8xf32>
    %c0_3 = arith.constant 0 : index
    %c0_4 = arith.constant 0 : index
    %c0_5 = arith.constant 0 : index
    %5 = vector.load %arg10[%c0_3, %c0_4, %c0_5] : memref<10x18x8xf32, #tpu.memory_space<vmem>>, vector<10x1x8xf32>
    tpu.vector_store %arg10[%c0_3, %c0_4, %c0_5], %4 {strides = array<i32>} : memref<10x18x8xf32, #tpu.memory_space<vmem>>, vector<10x1x8xf32>,
    %cst_6 = arith.constant 0.000000e+00 : f32
    %6 = vector.broadcast %cst_6 : f32 to vector<10x1x8xf32>
    %c0_7 = arith.constant 0 : index
    %c17 = arith.constant 17 : index
    %c0_8 = arith.constant 0 : index
    %7 = vector.load %arg10[%c0_7, %c17, %c0_8] : memref<10x18x8xf32, #tpu.memory_space<vmem>>, vector<10x1x8xf32>
    tpu.vector_store %arg10[%c0_7, %c17, %c0_8], %6 {strides = array<i32>} : memref<10x18x8xf32, #tpu.memory_space<vmem>>, vector<10x1x8xf32>,
    %c0_9 = arith.constant 0 : index
    %8 = arith.index_cast %1 : i32 to index
    %c0_10 = arith.constant 0 : index
    %c0_11 = arith.constant 0 : index
    %9 = vector.load %arg2[%c0_9, %8, %c0_10, %c0_11] : memref<1x16x16x8xf32, #tpu.memory_space<vmem>>, vector<1x8x16x8xf32>
    %10 = vector.shape_cast %9 : vector<1x8x16x8xf32> to vector<8x16x8xf32>
    %11 = vector.extract_strided_slice %10 {offsets = [0, 0, 0], sizes = [8, 16, 4], strides = [1, 1, 1]} : vector<8x16x8xf32> to vector<8x16x4xf32>
    %12 = vector.extract_strided_slice %10 {offsets = [0, 0, 4], sizes = [8, 16, 4], strides = [1, 1, 1]} : vector<8x16x8xf32> to vector<8x16x4xf32>
    %13 = vector.shape_cast %12 : vector<8x16x4xf32> to vector<128x4xf32>
    %cst_12 = arith.constant dense<0.000000e+00> : vector<128x8xf32>
    %14 = tpu.matmul %13, %2, %cst_12 {dimension_numbers = #tpu.dot_dimension_numbers<[1], [0], [0], [1], [0, 0, 1, 1], [], []>} : vector<128x4xf32>, vector<4x8xf32>, vector<128x8xf32> -> vector<128x8xf32>
    %15 = vector.broadcast %3 : vector<1x8xf32> to vector<128x8xf32>
    %16 = arith.addf %14, %15 : vector<128x8xf32>
    %cst_13 = arith.constant 0.000000e+00 : f32
    %17 = vector.broadcast %cst_13 : f32 to vector<128x8xf32>
    %18 = arith.maximumf %16, %17 : vector<128x8xf32>
    %19 = vector.shape_cast %18 : vector<128x8xf32> to vector<8x16x8xf32>
    %c1 = arith.constant 1 : index
    %c1_14 = arith.constant 1 : index
    %c0_15 = arith.constant 0 : index
    %20 = vector.load %arg10[%c1, %c1_14, %c0_15] : memref<10x18x8xf32, #tpu.memory_space<vmem>>, vector<8x16x8xf32>
    tpu.vector_store %arg10[%c1, %c1_14, %c0_15], %19 {strides = array<i32>} : memref<10x18x8xf32, #tpu.memory_space<vmem>>, vector<8x16x8xf32>,
    %c1_i32 = arith.constant 1 : i32
    %21 = arith.subi %1, %c1_i32 : i32
    %c0_i32 = arith.constant 0 : i32
    %22 = arith.maxsi %21, %c0_i32 : i32
    %c0_16 = arith.constant 0 : index
    %23 = arith.index_cast %22 : i32 to index
    %c0_17 = arith.constant 0 : index
    %c0_18 = arith.constant 0 : index
    %24 = vector.load %arg2[%c0_16, %23, %c0_17, %c0_18] : memref<1x16x16x8xf32, #tpu.memory_space<vmem>>, vector<1x1x16x8xf32>
    %25 = vector.shape_cast %24 : vector<1x1x16x8xf32> to vector<1x16x8xf32>
    %c0_i32_19 = arith.constant 0 : i32
    %26 = arith.cmpi sgt, %arg1, %c0_i32_19 : i32
    %27 = vector.extract_strided_slice %25 {offsets = [0, 0, 4], sizes = [1, 16, 4], strides = [1, 1, 1]} : vector<1x16x8xf32> to vector<1x16x4xf32>
    %28 = vector.shape_cast %27 : vector<1x16x4xf32> to vector<16x4xf32>
    %cst_20 = arith.constant dense<0.000000e+00> : vector<16x8xf32>
    %29 = tpu.matmul %28, %2, %cst_20 {dimension_numbers = #tpu.dot_dimension_numbers<[1], [0], [0], [1], [0, 0, 1, 1], [], []>} : vector<16x4xf32>, vector<4x8xf32>, vector<16x8xf32> -> vector<16x8xf32>
    %30 = vector.broadcast %3 : vector<1x8xf32> to vector<16x8xf32>
    %31 = arith.addf %29, %30 : vector<16x8xf32>
    %cst_21 = arith.constant 0.000000e+00 : f32
    %32 = vector.broadcast %cst_21 : f32 to vector<16x8xf32>
    %33 = arith.maximumf %31, %32 : vector<16x8xf32>
    %34 = vector.shape_cast %33 : vector<16x8xf32> to vector<1x16x8xf32>
    %cst_22 = arith.constant 0.000000e+00 : f32
    %35 = vector.broadcast %cst_22 : f32 to vector<1x16x8xf32>
    %36 = arith.select %26, %34, %35 : vector<1x16x8xf32>
    %c0_23 = arith.constant 0 : index
    %c1_24 = arith.constant 1 : index
    %c0_25 = arith.constant 0 : index
    %37 = vector.load %arg10[%c0_23, %c1_24, %c0_25] : memref<10x18x8xf32, #tpu.memory_space<vmem>>, vector<1x16x8xf32>
    tpu.vector_store %arg10[%c0_23, %c1_24, %c0_25], %36 {strides = array<i32>} : memref<10x18x8xf32, #tpu.memory_space<vmem>>, vector<1x16x8xf32>,
    %c8_i32_26 = arith.constant 8 : i32
    %38 = arith.addi %1, %c8_i32_26 : i32
    %c15_i32 = arith.constant 15 : i32
    %39 = arith.minsi %38, %c15_i32 : i32
    %c0_27 = arith.constant 0 : index
    %40 = arith.index_cast %39 : i32 to index
    %c0_28 = arith.constant 0 : index
    %c0_29 = arith.constant 0 : index
    %41 = vector.load %arg2[%c0_27, %40, %c0_28, %c0_29] : memref<1x16x16x8xf32, #tpu.memory_space<vmem>>, vector<1x1x16x8xf32>
    %42 = vector.shape_cast %41 : vector<1x1x16x8xf32> to vector<1x16x8xf32>
    %c1_i32_30 = arith.constant 1 : i32
    %43 = arith.cmpi slt, %arg1, %c1_i32_30 : i32
    %44 = vector.extract_strided_slice %42 {offsets = [0, 0, 4], sizes = [1, 16, 4], strides = [1, 1, 1]} : vector<1x16x8xf32> to vector<1x16x4xf32>
    %45 = vector.shape_cast %44 : vector<1x16x4xf32> to vector<16x4xf32>
    %cst_31 = arith.constant dense<0.000000e+00> : vector<16x8xf32>
    %46 = tpu.matmul %45, %2, %cst_31 {dimension_numbers = #tpu.dot_dimension_numbers<[1], [0], [0], [1], [0, 0, 1, 1], [], []>} : vector<16x4xf32>, vector<4x8xf32>, vector<16x8xf32> -> vector<16x8xf32>
    %47 = vector.broadcast %3 : vector<1x8xf32> to vector<16x8xf32>
    %48 = arith.addf %46, %47 : vector<16x8xf32>
    %cst_32 = arith.constant 0.000000e+00 : f32
    %49 = vector.broadcast %cst_32 : f32 to vector<16x8xf32>
    %50 = arith.maximumf %48, %49 : vector<16x8xf32>
    %51 = vector.shape_cast %50 : vector<16x8xf32> to vector<1x16x8xf32>
    %cst_33 = arith.constant 0.000000e+00 : f32
    %52 = vector.broadcast %cst_33 : f32 to vector<1x16x8xf32>
    %53 = arith.select %43, %51, %52 : vector<1x16x8xf32>
    %c9 = arith.constant 9 : index
    %c1_34 = arith.constant 1 : index
    %c0_35 = arith.constant 0 : index
    %54 = vector.load %arg10[%c9, %c1_34, %c0_35] : memref<10x18x8xf32, #tpu.memory_space<vmem>>, vector<1x16x8xf32>
    tpu.vector_store %arg10[%c9, %c1_34, %c0_35], %53 {strides = array<i32>} : memref<10x18x8xf32, #tpu.memory_space<vmem>>, vector<1x16x8xf32>,
    %cst_36 = arith.constant 0.000000e+00 : f32
    %55 = vector.broadcast %cst_36 : f32 to vector<8x16x8xf32>
    %c0_37 = arith.constant 0 : index
    %c0_38 = arith.constant 0 : index
    %c0_39 = arith.constant 0 : index
    %56 = vector.load %arg10[%c0_37, %c0_38, %c0_39] : memref<10x18x8xf32, #tpu.memory_space<vmem>>, vector<8x16x8xf32>
    %c0_40 = arith.constant 0 : index
    %c0_41 = arith.constant 0 : index
    %c0_42 = arith.constant 0 : index
    %57 = vector.load %arg5[%c0_40, %c0_41, %c0_42] : memref<3x3x8xf32, #tpu.memory_space<vmem>>, vector<1x1x8xf32>
    %58 = vector.shape_cast %57 : vector<1x1x8xf32> to vector<8xf32>
    %59 = vector.shape_cast %58 : vector<8xf32> to vector<1x1x8xf32>
    %60 = vector.broadcast %59 : vector<1x1x8xf32> to vector<8x16x8xf32>
    %61 = arith.mulf %56, %60 : vector<8x16x8xf32>
    %62 = arith.addf %55, %61 : vector<8x16x8xf32>
    %c0_43 = arith.constant 0 : index
    %c1_44 = arith.constant 1 : index
    %c0_45 = arith.constant 0 : index
    %63 = vector.load %arg10[%c0_43, %c1_44, %c0_45] : memref<10x18x8xf32, #tpu.memory_space<vmem>>, vector<8x16x8xf32>
    %c0_46 = arith.constant 0 : index
    %c1_47 = arith.constant 1 : index
    %c0_48 = arith.constant 0 : index
    %64 = vector.load %arg5[%c0_46, %c1_47, %c0_48] : memref<3x3x8xf32, #tpu.memory_space<vmem>>, vector<1x1x8xf32>
    %65 = vector.shape_cast %64 : vector<1x1x8xf32> to vector<8xf32>
    %66 = vector.shape_cast %65 : vector<8xf32> to vector<1x1x8xf32>
    %67 = vector.broadcast %66 : vector<1x1x8xf32> to vector<8x16x8xf32>
    %68 = arith.mulf %63, %67 : vector<8x16x8xf32>
    %69 = arith.addf %62, %68 : vector<8x16x8xf32>
    %c0_49 = arith.constant 0 : index
    %c2 = arith.constant 2 : index
    %c0_50 = arith.constant 0 : index
    %70 = vector.load %arg10[%c0_49, %c2, %c0_50] : memref<10x18x8xf32, #tpu.memory_space<vmem>>, vector<8x16x8xf32>
    %c0_51 = arith.constant 0 : index
    %c2_52 = arith.constant 2 : index
    %c0_53 = arith.constant 0 : index
    %71 = vector.load %arg5[%c0_51, %c2_52, %c0_53] : memref<3x3x8xf32, #tpu.memory_space<vmem>>, vector<1x1x8xf32>
    %72 = vector.shape_cast %71 : vector<1x1x8xf32> to vector<8xf32>
    %73 = vector.shape_cast %72 : vector<8xf32> to vector<1x1x8xf32>
    %74 = vector.broadcast %73 : vector<1x1x8xf32> to vector<8x16x8xf32>
    %75 = arith.mulf %70, %74 : vector<8x16x8xf32>
    %76 = arith.addf %69, %75 : vector<8x16x8xf32>
    %c1_54 = arith.constant 1 : index
    %c0_55 = arith.constant 0 : index
    %c0_56 = arith.constant 0 : index
    %77 = vector.load %arg10[%c1_54, %c0_55, %c0_56] : memref<10x18x8xf32, #tpu.memory_space<vmem>>, vector<8x16x8xf32>
    %c1_57 = arith.constant 1 : index
    %c0_58 = arith.constant 0 : index
    %c0_59 = arith.constant 0 : index
    %78 = vector.load %arg5[%c1_57, %c0_58, %c0_59] : memref<3x3x8xf32, #tpu.memory_space<vmem>>, vector<1x1x8xf32>
    %79 = vector.shape_cast %78 : vector<1x1x8xf32> to vector<8xf32>
    %80 = vector.shape_cast %79 : vector<8xf32> to vector<1x1x8xf32>
    %81 = vector.broadcast %80 : vector<1x1x8xf32> to vector<8x16x8xf32>
    %82 = arith.mulf %77, %81 : vector<8x16x8xf32>
    %83 = arith.addf %76, %82 : vector<8x16x8xf32>
    %c1_60 = arith.constant 1 : index
    %c1_61 = arith.constant 1 : index
    %c0_62 = arith.constant 0 : index
    %84 = vector.load %arg10[%c1_60, %c1_61, %c0_62] : memref<10x18x8xf32, #tpu.memory_space<vmem>>, vector<8x16x8xf32>
    %c1_63 = arith.constant 1 : index
    %c1_64 = arith.constant 1 : index
    %c0_65 = arith.constant 0 : index
    %85 = vector.load %arg5[%c1_63, %c1_64, %c0_65] : memref<3x3x8xf32, #tpu.memory_space<vmem>>, vector<1x1x8xf32>
    %86 = vector.shape_cast %85 : vector<1x1x8xf32> to vector<8xf32>
    %87 = vector.shape_cast %86 : vector<8xf32> to vector<1x1x8xf32>
    %88 = vector.broadcast %87 : vector<1x1x8xf32> to vector<8x16x8xf32>
    %89 = arith.mulf %84, %88 : vector<8x16x8xf32>
    %90 = arith.addf %83, %89 : vector<8x16x8xf32>
    %c1_66 = arith.constant 1 : index
    %c2_67 = arith.constant 2 : index
    %c0_68 = arith.constant 0 : index
    %91 = vector.load %arg10[%c1_66, %c2_67, %c0_68] : memref<10x18x8xf32, #tpu.memory_space<vmem>>, vector<8x16x8xf32>
    %c1_69 = arith.constant 1 : index
    %c2_70 = arith.constant 2 : index
    %c0_71 = arith.constant 0 : index
    %92 = vector.load %arg5[%c1_69, %c2_70, %c0_71] : memref<3x3x8xf32, #tpu.memory_space<vmem>>, vector<1x1x8xf32>
    %93 = vector.shape_cast %92 : vector<1x1x8xf32> to vector<8xf32>
    %94 = vector.shape_cast %93 : vector<8xf32> to vector<1x1x8xf32>
    %95 = vector.broadcast %94 : vector<1x1x8xf32> to vector<8x16x8xf32>
    %96 = arith.mulf %91, %95 : vector<8x16x8xf32>
    %97 = arith.addf %90, %96 : vector<8x16x8xf32>
    %c2_72 = arith.constant 2 : index
    %c0_73 = arith.constant 0 : index
    %c0_74 = arith.constant 0 : index
    %98 = vector.load %arg10[%c2_72, %c0_73, %c0_74] : memref<10x18x8xf32, #tpu.memory_space<vmem>>, vector<8x16x8xf32>
    %c2_75 = arith.constant 2 : index
    %c0_76 = arith.constant 0 : index
    %c0_77 = arith.constant 0 : index
    %99 = vector.load %arg5[%c2_75, %c0_76, %c0_77] : memref<3x3x8xf32, #tpu.memory_space<vmem>>, vector<1x1x8xf32>
    %100 = vector.shape_cast %99 : vector<1x1x8xf32> to vector<8xf32>
    %101 = vector.shape_cast %100 : vector<8xf32> to vector<1x1x8xf32>
    %102 = vector.broadcast %101 : vector<1x1x8xf32> to vector<8x16x8xf32>
    %103 = arith.mulf %98, %102 : vector<8x16x8xf32>
    %104 = arith.addf %97, %103 : vector<8x16x8xf32>
    %c2_78 = arith.constant 2 : index
    %c1_79 = arith.constant 1 : index
    %c0_80 = arith.constant 0 : index
    %105 = vector.load %arg10[%c2_78, %c1_79, %c0_80] : memref<10x18x8xf32, #tpu.memory_space<vmem>>, vector<8x16x8xf32>
    %c2_81 = arith.constant 2 : index
    %c1_82 = arith.constant 1 : index
    %c0_83 = arith.constant 0 : index
    %106 = vector.load %arg5[%c2_81, %c1_82, %c0_83] : memref<3x3x8xf32, #tpu.memory_space<vmem>>, vector<1x1x8xf32>
    %107 = vector.shape_cast %106 : vector<1x1x8xf32> to vector<8xf32>
    %108 = vector.shape_cast %107 : vector<8xf32> to vector<1x1x8xf32>
    %109 = vector.broadcast %108 : vector<1x1x8xf32> to vector<8x16x8xf32>
    %110 = arith.mulf %105, %109 : vector<8x16x8xf32>
    %111 = arith.addf %104, %110 : vector<8x16x8xf32>
    %c2_84 = arith.constant 2 : index
    %c2_85 = arith.constant 2 : index
    %c0_86 = arith.constant 0 : index
    %112 = vector.load %arg10[%c2_84, %c2_85, %c0_86] : memref<10x18x8xf32, #tpu.memory_space<vmem>>, vector<8x16x8xf32>
    %c2_87 = arith.constant 2 : index
    %c2_88 = arith.constant 2 : index
    %c0_89 = arith.constant 0 : index
    %113 = vector.load %arg5[%c2_87, %c2_88, %c0_89] : memref<3x3x8xf32, #tpu.memory_space<vmem>>, vector<1x1x8xf32>
    %114 = vector.shape_cast %113 : vector<1x1x8xf32> to vector<8xf32>
    %115 = vector.shape_cast %114 : vector<8xf32> to vector<1x1x8xf32>
    %116 = vector.broadcast %115 : vector<1x1x8xf32> to vector<8x16x8xf32>
    %117 = arith.mulf %112, %116 : vector<8x16x8xf32>
    %118 = arith.addf %111, %117 : vector<8x16x8xf32>
    %119 = vector.shape_cast %118 : vector<8x16x8xf32> to vector<128x8xf32>
    %c0_90 = arith.constant 0 : index
    %c0_91 = arith.constant 0 : index
    %120 = vector.load %arg6[%c0_90, %c0_91] : memref<8x8xf32, #tpu.memory_space<vmem>>, vector<8x8xf32>
    %cst_92 = arith.constant dense<0.000000e+00> : vector<128x8xf32>
    %121 = tpu.matmul %119, %120, %cst_92 {dimension_numbers = #tpu.dot_dimension_numbers<[1], [0], [0], [1], [0, 0, 1, 1], [], []>} : vector<128x8xf32>, vector<8x8xf32>, vector<128x8xf32> -> vector<128x8xf32>
    %c0_93 = arith.constant 0 : index
    %c0_94 = arith.constant 0 : index
    %122 = vector.load %arg8[%c0_93, %c0_94] : memref<1x8xf32, #tpu.memory_space<vmem>>, vector<1x8xf32>
    %123 = vector.broadcast %122 : vector<1x8xf32> to vector<128x8xf32>
    %124 = arith.addf %121, %123 : vector<128x8xf32>
    %cst_95 = arith.constant 0.000000e+00 : f32
    %125 = vector.broadcast %cst_95 : f32 to vector<128x8xf32>
    %126 = arith.maximumf %124, %125 : vector<128x8xf32>
    %127 = vector.shape_cast %11 : vector<8x16x4xf32> to vector<128x4xf32>
    %c0_96 = arith.constant 0 : index
    %c0_97 = arith.constant 0 : index
    %128 = vector.load %arg7[%c0_96, %c0_97] : memref<4x8xf32, #tpu.memory_space<vmem>>, vector<4x8xf32>
    %cst_98 = arith.constant dense<0.000000e+00> : vector<128x8xf32>
    %129 = tpu.matmul %127, %128, %cst_98 {dimension_numbers = #tpu.dot_dimension_numbers<[1], [0], [0], [1], [0, 0, 1, 1], [], []>} : vector<128x4xf32>, vector<4x8xf32>, vector<128x8xf32> -> vector<128x8xf32>
    %130 = arith.addf %129, %126 : vector<128x8xf32>
    %131 = vector.shape_cast %130 : vector<128x8xf32> to vector<8x16x8xf32>
    %c0_99 = arith.constant 0 : index
    %c0_100 = arith.constant 0 : index
    %c0_101 = arith.constant 0 : index
    %c0_102 = arith.constant 0 : index
    %132 = vector.load %arg9[%c0_99, %c0_100, %c0_101, %c0_102] : memref<1x8x16x8xf32, #tpu.memory_space<vmem>>, vector<1x8x16x8xf32>
    %133 = vector.shape_cast %132 : vector<1x8x16x8xf32> to vector<8x16x8xf32>
    %134 = vector.shape_cast %131 : vector<8x16x8xf32> to vector<1x8x16x8xf32>
    tpu.vector_store %arg9[%c0_99, %c0_100, %c0_101, %c0_102], %134 {strides = array<i32>} : memref<1x8x16x8xf32, #tpu.memory_space<vmem>>, vector<1x8x16x8xf32>,
    return
  }
  func.func @transform_0(%arg0: i32, %arg1: i32) -> (i32, i32, i32, i32) {
    %c0_i32 = arith.constant 0 : i32
    %c0_i32_0 = arith.constant 0 : i32
    %c0_i32_1 = arith.constant 0 : i32
    %c0_i32_2 = arith.constant 0 : i32
    return %arg0, %c0_i32, %c0_i32_0, %c0_i32_1 : i32, i32, i32, i32
  }
  func.func @transform_1(%arg0: i32, %arg1: i32) -> (i32, i32) {
    %c0_i32 = arith.constant 0 : i32
    %c0_i32_0 = arith.constant 0 : i32
    %c0_i32_1 = arith.constant 0 : i32
    return %c0_i32, %c0_i32_0 : i32, i32
  }
  func.func @transform_2(%arg0: i32, %arg1: i32) -> (i32, i32) {
    %c0_i32 = arith.constant 0 : i32
    %c0_i32_0 = arith.constant 0 : i32
    %c0_i32_1 = arith.constant 0 : i32
    return %c0_i32, %c0_i32_0 : i32, i32
  }
  func.func @transform_3(%arg0: i32, %arg1: i32) -> (i32, i32, i32) {
    %c0_i32 = arith.constant 0 : i32
    %c0_i32_0 = arith.constant 0 : i32
    %c0_i32_1 = arith.constant 0 : i32
    %c0_i32_2 = arith.constant 0 : i32
    return %c0_i32, %c0_i32_0, %c0_i32_1 : i32, i32, i32
  }
  func.func @transform_4(%arg0: i32, %arg1: i32) -> (i32, i32) {
    %c0_i32 = arith.constant 0 : i32
    %c0_i32_0 = arith.constant 0 : i32
    %c0_i32_1 = arith.constant 0 : i32
    return %c0_i32, %c0_i32_0 : i32, i32
  }
  func.func @transform_5(%arg0: i32, %arg1: i32) -> (i32, i32) {
    %c0_i32 = arith.constant 0 : i32
    %c0_i32_0 = arith.constant 0 : i32
    %c0_i32_1 = arith.constant 0 : i32
    return %c0_i32, %c0_i32_0 : i32, i32
  }
  func.func @transform_6(%arg0: i32, %arg1: i32) -> (i32, i32) {
    %c0_i32 = arith.constant 0 : i32
    %c0_i32_0 = arith.constant 0 : i32
    %c0_i32_1 = arith.constant 0 : i32
    return %c0_i32, %c0_i32_0 : i32, i32
  }
  func.func @transform_7(%arg0: i32, %arg1: i32) -> (i32, i32, i32, i32) {
    %c0_i32 = arith.constant 0 : i32
    %c0_i32_0 = arith.constant 0 : i32
    %c0_i32_1 = arith.constant 0 : i32
    return %arg0, %arg1, %c0_i32, %c0_i32_0 : i32, i32, i32, i32
  }
}

</mosaic_0001>

<bundles_post_ra>
// kernel: tpu_custom_call.1
= control target key start
LH: loop header
LB: loop body
LE: loop exit
PB: predicated region body
PF: predicated region fallthrough
CT: control target
= control target key end

     0   :  { %s2175_s24 = smov 0   ;;  %s2177_s25 = smov 0   ;;  %s2954_s0 = inlined_call_operand.vmem [shape: f32[2,16,16,8], index: 0, kind: input, shape index: {}]   ;;  %s2955_s1 = inlined_call_operand.vmem [shape: f32[4,8], index: 1, kind: input, shape index: {}]   ;;  %s2956_s2 = inlined_call_operand.vmem [shape: f32[1,8], index: 2, kind: input, shape index: {}]   ;;  %s2957_s3 = inlined_call_operand.vmem [shape: f32[3,3,8], index: 3, kind: input, shape index: {}]   ;;  %s2958_s4 = inlined_call_operand.vmem [shape: f32[8,8], index: 4, kind: input, shape index: {}]   ;;  %s2959_s5 = inlined_call_operand.vmem [shape: f32[4,8], index: 5, kind: input, shape index: {}]   ;;  %s2960_s6 = inlined_call_operand.vmem [shape: f32[1,8], index: 6, kind: input, shape index: {}]   ;;  %s2961_s7 = inlined_call_operand.vmem [shape: f32[2,16,16,8], index: 7, kind: output, shape index: {}]  }
   0x1   :  { %s2179_s26 = smov 0   ;;  %s2181_s27 = smov 0  }
   0x2   :  { %s2183_s28 = smov 0  }
   0x3 LB: > { %s26_s29 = sadd.s32 1, %s2123_s26  ;;  %s29_s30 = sadd.s32 1, %s2127_s27  ;;  %s2131_s28 = sphi %s2183_s28, %s17_s28   ;;  %s2127_s27 = sphi %s2181_s27, %s3012_s27   ;;  %s2123_s26 = sphi %s2179_s26, %s3011_s26   ;;  %s2119_s25 = sphi %s2177_s25, %s3010_s25   ;;  %s2115_s24 = sphi %s2175_s24, %s3009_s24  }
   0x4   : > { %p27_p0 = scmp.ge.s32.totalorder %s26_s29, 2  ;;  %p1815_p1 = scmp.ge.s32.totalorder %s2131_s28, 1 }
   0x5   : > { %p251_p2 = scmp.lt.s32.totalorder %s2131_s28, 5 }
   0x6   : > { %s3014_s29 = smov (%p27_p0, %s26_s29), 0  ;;  %s3016_s30 = smov (!%p27_p0, %s29_s30), %s2127_s27 }
   0x7   : > { %p252_p3 = pnand %p1815_p1, %p251_p2  ;;  %p31_p4 = scmp.ge.s32.totalorder %s3016_s30, 2 }
   0x9   : > { %s3018_s30 = smov (%p31_p4, %s3016_s30), 0  ;;  %255 = sbr.rel (%p252_p3) target bundleno = 636 (0x27c), region = 48 }
   0xe   : > { %p288_p5 = scmp.lt.s32.totalorder %s2119_s25, 1  ;;  %v2210_v0 = vld [vmem:[%s2955_s1] sm:$0xf]  ;;  %vm433_vm0 = vcmask 1043456   ;;  %s1903_s10 = sshll.u32 %s2115_s24, 7  ;;  %vm400_vm1 = vcmask 31744  }
   0xf   : > { %s2214_s11 = sshll.u32 %s2115_s24, 3  ;;  %2049 = vmatprep.subr.msk.mxu1 %vm433_vm0, %v2210_v0  ;;  %1961 = vmatprep.subr.msk.mxu0 %vm433_vm0, %v2210_v0  ;;  %s2133_s20 = smov 124   ;;  %vm307_vm2 = vcmask 57344   ;;  %v2134_v41 = vmov 0.0   ;;  %v1518_v42 = vld [vmem:[%s2959_s5] sm:$0xf] }
  0x10   : > { %s3020_s25 = smov (!%p288_p5, %s2119_s25), 1  ;;  %2050 = vmatpush3.msk.msra.mxu1 %vm433_vm0, %v2210_v0  ;;  %1962 = vmatpush3.msk.msra.mxu0 %vm433_vm0, %v2210_v0  ;;  %p296_p6 = scmp.lt.s32.totalorder %s2214_s11, 15  ;;  %308 = vst.msk [vmem:[#allocation2] sm:$0x1] %vm307_vm2, %v2134_v41  ;;  %309 = vst.msk [vmem:[#allocation2 + $0x18] sm:$0x1] %vm307_vm2, %v2134_v41 }
  0x11   : > { %s1842_s12 = sadd.s32 4294967295, %s2214_s11  ;;  %1987 = vmatprep.subr.msk.mxu1 %vm433_vm0, %v2210_v0  ;;  %s1902_s13 = sshll.u32 %s3020_s25, 8  ;;  %310 = vst.msk [vmem:[#allocation2 + $0x30] sm:$0x1] %vm307_vm2, %v2134_v41  ;;  %311 = vst.msk [vmem:[#allocation2 + $0x48] sm:$0x1] %vm307_vm2, %v2134_v41  ;;  %2023 = vmatprep.subr.msk.mxu0 %vm433_vm0, %v1518_v42 }
  0x12   : > { %s2231_s16 = scalar_lea.vmem %s2954_s0, %s1902_s13  ;;  %p617_p7 = scmp.gt.s32.totalorder %s1842_s12, 0  ;;  %312 = vst.msk [vmem:[#allocation2 + $0x60] sm:$0x1] %vm307_vm2, %v2134_v41  ;;  %313 = vst.msk [vmem:[#allocation2 + $0x78] sm:$0x1] %vm307_vm2, %v2134_v41  ;;  %v1301_v43 = vld [vmem:[%s2958_s4] sm:$0xff] }
  0x13   : > { %s2234_s17 = scalar_lea.vmem %s2231_s16, %s1903_s10  ;;  %s1820_s18 = sshll.u32 %s3020_s25, 5  ;;  %314 = vst.msk [vmem:[#allocation2 + $0x90] sm:$0x1] %vm307_vm2, %v2134_v41  ;;  %315 = vst.msk [vmem:[#allocation2 + $0xa8] sm:$0x1] %vm307_vm2, %v2134_v41  ;;  %vm599_vm3 = vcmask 64512  }
  0x14   : > { %v2237_v1 = vld [vmem:[%s2234_s17 + $0x50] sm:$0xff]  ;;  %v2240_v2 = vld [vmem:[%s2234_s17 + $0x60] sm:$0xff]  ;;  %s297_s19 = scalar_select %p296_p6, %s2214_s11, 15  ;;  %v2248_v3 = vld [vmem:[%s2234_s17 + $0x58] sm:$0xff]  ;;  %316 = vst.msk [vmem:[#allocation2 + $0xc0] sm:$0x1] %vm307_vm2, %v2134_v41 }
  0x15   : > { %388 = vrot.lane.b32.xlu0 %v2237_v1, %s2133_s20  ;;  %392 = vrot.lane.b32.xlu1 %v2240_v2, %s2133_s20  ;;  %s3022_s12 = smov (!%p617_p7, %s1842_s12), 0  ;;  %v2251_v4 = vld [vmem:[%s2234_s17 + $0x68] sm:$0xff]  ;;  %v2260_v5 = vld [vmem:[%s2234_s17 + $0x70] sm:$0xff]  ;;  %s718_s8 = sadd.s32 8, %s2214_s11  ;;  %317 = vst.msk [vmem:[#allocation2 + $0xd8] sm:$0x1] %vm307_vm2, %v2134_v41 }
  0x16   : > { %s1819_s21 = sshll.u32 %s297_s19, 1  ;;  %s1843_s23 = sshll.u32 %s3022_s12, 4  ;;  %v2263_v6 = vld [vmem:[%s2234_s17 + $0x78] sm:$0xff]  ;;  %v2273_v9 = vld [vmem:[%s2234_s17] sm:$0xff]  ;;  %v2276_v10 = vld [vmem:[%s2234_s17 + $0x8] sm:$0xff] }
  0x17   : > { %s2253_s22 = sadd.s32 %s1820_s18, %s1819_s21  ;;  %s620_s25 = scalar_lea.vmem %s2231_s16, %s1843_s23  ;;  %v2284_v11 = vld [vmem:[%s2234_s17 + $0x10] sm:$0xff]  ;;  %v2287_v12 = vld [vmem:[%s2234_s17 + $0x18] sm:$0xff]  ;;  %v2294_v13 = vld [vmem:[%s2234_s17 + $0x20] sm:$0xff]  ;;  %318 = vst.msk [vmem:[#allocation2 + $0x11] sm:$0x1] %vm307_vm2, %v2134_v41 }
  0x18   : > { %v621_v7 = vld [vmem:[%s620_s25] sm:$0xff]  ;;  %v622_v8 = vld [vmem:[%s620_s25 + $0x8] sm:$0xff]  ;;  %p719_p8 = scmp.lt.s32.totalorder %s718_s8, 15  ;;  %v2304_v15 = vld [vmem:[%s2234_s17 + $0x30] sm:$0xff]  ;;  %319 = vst.msk [vmem:[#allocation2 + $0x29] sm:$0x1] %vm307_vm2, %v2134_v41 }
  0x19   : > { %390 = vrot.lane.b32.xlu0 %v2248_v3, %s2133_s20  ;;  %394 = vrot.lane.b32.xlu1 %v2251_v4, %s2133_s20  ;;  %v2297_v14 = vld [vmem:[%s2234_s17 + $0x28] sm:$0xff]  ;;  %v2307_v16 = vld [vmem:[%s2234_s17 + $0x38] sm:$0xff]  ;;  %320 = vst.msk [vmem:[#allocation2 + $0x41] sm:$0x1] %vm307_vm2, %v2134_v41  ;;  %321 = vst.msk [vmem:[#allocation2 + $0x59] sm:$0x1] %vm307_vm2, %v2134_v41 }
  0x1a   : > { %s3024_s8 = smov (!%p719_p8, %s718_s8), 15  ;;  %v2314_v17 = vld [vmem:[%s2234_s17 + $0x40] sm:$0xff]  ;;  %v2317_v18 = vld [vmem:[%s2234_s17 + $0x48] sm:$0xff]  ;;  %322 = vst.msk [vmem:[#allocation2 + $0x71] sm:$0x1] %vm307_vm2, %v2134_v41  ;;  %p623_p9 = scmp.gt.s32.totalorder %s2115_s24, 0 }
  0x1b   : > { %s1847_s9 = sshll.u32 %s3024_s8, 4  ;;  %323 = vst.msk [vmem:[#allocation2 + $0x89] sm:$0x1] %vm307_vm2, %v2134_v41  ;;  %324 = vst.msk [vmem:[#allocation2 + $0xa1] sm:$0x1] %vm307_vm2, %v2134_v41  ;;  %p725_p10 = scmp.lt.s32.totalorder %s2115_s24, 1 }
  0x1c   : > { %s722_s10 = scalar_lea.vmem %s2231_s16, %s1847_s9  ;;  %325 = vst.msk [vmem:[#allocation2 + $0xb9] sm:$0x1] %vm307_vm2, %v2134_v41  ;;  %326 = vst.msk [vmem:[#allocation2 + $0xd1] sm:$0x1] %vm307_vm2, %v2134_v41  ;;  %v2415_v44 = vld [vmem:[%s2956_s2] ss:$0 sm:$0xff] }
  0x1d   : > { %396 = vrot.lane.b32.xlu0 %v2260_v5, %s2133_s20  ;;  %398 = vrot.lane.b32.xlu1 %v2263_v6, %s2133_s20  ;;  %v723_v19 = vld [vmem:[%s722_s10] sm:$0xff]  ;;  %v724_v20 = vld [vmem:[%s722_s10 + $0x8] sm:$0xff]  ;;  %327 = vst.msk [vmem:[#allocation2 + $0xe9] sm:$0x1] %vm307_vm2, %v2134_v41  ;;  %s711_s17 = scalar_select %p623_p9, 1, 0 }
  0x1e   : > { %s2427_s18 = scalar_select %p725_p10, 1, 0  ;;  %v2434_v63 = vld [vmem:[%s2957_s3 + $0x9] ss:$0 sm:$0xff] }
  0x1f   : > { %v712_v62 = vstv %s711_s17  ;;  %s1821_s21 = sshll.u32 %s2253_s22, 3 }
  0x20   : > { %vm2455_vm4 = vcmp.eq.s32.totalorder %v712_v62, 1  ;;  %s2891_s8 = scalar_lea.vmem %s2961_s7, %s1821_s21 }
  0x21   : > { %626 = vrot.lane.b32.xlu0 %v621_v7, %s2133_s20  ;;  %628 = vrot.lane.b32.xlu1 %v622_v8, %s2133_s20  ;;  %v2448_v7 = vld [vmem:[%s2957_s3 + $0x5] ss:$0 sm:$0xff]  ;;  %v2453_v8 = vld [vmem:[%s2957_s3 + $0x6] ss:$0 sm:$0xff] }
  0x25   : > { %368 = vrot.lane.b32.xlu0 %v2273_v9, %s2133_s20  ;;  %370 = vrot.lane.b32.xlu1 %v2276_v10, %s2133_s20 }
  0x29   : > { %372 = vrot.lane.b32.xlu0 %v2284_v11, %s2133_s20  ;;  %374 = vrot.lane.b32.xlu1 %v2287_v12, %s2133_s20 }
  0x2d   : > { %376 = vrot.lane.b32.xlu0 %v2294_v13, %s2133_s20  ;;  %378 = vrot.lane.b32.xlu1 %v2297_v14, %s2133_s20 }
  0x31   : > { %380 = vrot.lane.b32.xlu0 %v2304_v15, %s2133_s20  ;;  %382 = vrot.lane.b32.xlu1 %v2307_v16, %s2133_s20 }
  0x35   : > { %384 = vrot.lane.b32.xlu0 %v2314_v17, %s2133_s20  ;;  %386 = vrot.lane.b32.xlu1 %v2317_v18, %s2133_s20 }
  0x39   : > { %728 = vrot.lane.b32.xlu0 %v723_v19, %s2133_s20  ;;  %730 = vrot.lane.b32.xlu1 %v724_v20, %s2133_s20 }
  0x87   : > { %v389_v21 = vpop.permute.xlu0 %388  ;;  %v393_v22 = vpop.permute.xlu1 %392 }
  0x88   : > { %1978 = vmatprep.mubr.msk.f32.mxu1 %vm400_vm1, %v389_v21 }
  0x8b   : > { %v391_v23 = vpop.permute.xlu0 %390  ;;  %v395_v24 = vpop.permute.xlu1 %394 }
  0x8c   : > { %1979 = vmatmul.mubr.msk.f32.vlgmr.msra.gmra.mxu1 %vm400_vm1, %v391_v23 }
  0x8d   : > { %1988 = vmatpush3.msk.msra.mxu1 %vm433_vm0, %v2210_v0  ;;  %1981 = vmatprep.mubr.msk.f32.mxu1 %vm400_vm1, %v393_v22 }
  0x8e   : > { %1992 = vmatprep.subr.msk.mxu1 %vm433_vm0, %v2210_v0 }
  0x8f   : > { %v397_v25 = vpop.permute.xlu0 %396  ;;  %v399_v26 = vpop.permute.xlu1 %398 }
  0x90   : > { %1982 = vmatmul.mubr.msk.f32.gmra.mxu1 %vm400_vm1, %v395_v24 }
  0x91   : > { %1984 = vmatprep.mubr.msk.f32.mxu1 %vm400_vm1, %v397_v25  ;;  %v2484_v25 = vld [vmem:[%s2957_s3 + $0x4] ss:$0 sm:$0xff] }
  0x93   : > { %v627_v27 = vpop.permute.xlu0 %626  ;;  %v629_v28 = vpop.permute.xlu1 %628 }
  0x94   : > { %1985 = vmatmul.mubr.msk.f32.gmra.mxu1 %vm400_vm1, %v399_v26 }
  0x95   : > { %1989 = vmatprep.mubr.msk.f32.mxu1 %vm400_vm1, %v627_v27 }
  0x97   : > { %v369_v29 = vpop.permute.xlu0 %368  ;;  %v371_v30 = vpop.permute.xlu1 %370 }
  0x98   : > { %1990 = vmatmul.mubr.msk.f32.vlgmr.msra.gmra.mxu1 %vm400_vm1, %v629_v28  ;;  %1963 = vmatprep.mubr.msk.f32.mxu0 %vm400_vm1, %v369_v29 }
  0x99   : > { %1964 = vmatmul.mubr.msk.f32.vlgmr.msra.gmra.mxu0 %vm400_vm1, %v371_v30  ;;  %1993 = vmatpush3.msk.msra.mxu1 %vm433_vm0, %v2210_v0 }
  0x9a   : > { %2024 = vmatpush3.msk.msra.mxu0 %vm433_vm0, %v1518_v42  ;;  %1997 = vmatprep.subr.mxu1 %v1301_v43 }
  0x9b   : > { %v373_v31 = vpop.permute.xlu0 %372  ;;  %v375_v32 = vpop.permute.xlu1 %374 }
  0x9c   : > { %1966 = vmatprep.mubr.msk.f32.mxu0 %vm400_vm1, %v373_v31 }
  0x9d   : > { %1967 = vmatmul.mubr.msk.f32.gmra.mxu0 %vm400_vm1, %v375_v32 }
  0x9f   : > { %v377_v33 = vpop.permute.xlu0 %376  ;;  %v379_v34 = vpop.permute.xlu1 %378 }
  0xa0   : > { %1969 = vmatprep.mubr.msk.f32.mxu0 %vm400_vm1, %v377_v33 }
  0xa1   : > { %1970 = vmatmul.mubr.msk.f32.gmra.mxu0 %vm400_vm1, %v379_v34 }
  0xa3   : > { %v381_v35 = vpop.permute.xlu0 %380  ;;  %v383_v36 = vpop.permute.xlu1 %382 }
  0xa4   : > { %1972 = vmatprep.mubr.msk.f32.mxu0 %vm400_vm1, %v381_v35 }
  0xa5   : > { %1973 = vmatmul.mubr.msk.f32.gmra.mxu0 %vm400_vm1, %v383_v36  ;;  %v2507_v36 = vld [vmem:[%s2957_s3] ss:$0 sm:$0xff] }
  0xa7   : > { %v385_v37 = vpop.permute.xlu0 %384  ;;  %v387_v38 = vpop.permute.xlu1 %386 }
  0xa8   : > { %1975 = vmatprep.mubr.msk.f32.mxu0 %vm400_vm1, %v385_v37 }
  0xa9   : > { %1976 = vmatmul.mubr.msk.f32.gmra.mxu0 %vm400_vm1, %v387_v38 }
  0xaa   : > { %2025 = vmatprep.mubr.msk.f32.mxu0 %vm400_vm1, %v2273_v9 }
  0xab   : > { %v729_v39 = vpop.permute.xlu0 %728  ;;  %v731_v40 = vpop.permute.xlu1 %730 }
  0xac   : > { %1994 = vmatprep.mubr.msk.f32.mxu1 %vm400_vm1, %v729_v39 }
  0xad   : > { %1995 = vmatmul.mubr.msk.f32.vlgmr.msra.gmra.mxu1 %vm400_vm1, %v731_v40  ;;  %2026 = vmatmul.mubr.msk.f32.vlgmr.msra.gmra.mxu0 %vm400_vm1, %v2276_v10 }
  0xae   : > { %2028 = vmatprep.mubr.msk.f32.mxu0 %vm400_vm1, %v2284_v11  ;;  %1998 = vmatpush3.msra.mxu1 %v1301_v43 }
  0xb1   : > { %2029 = vmatmul.mubr.msk.f32.gmra.mxu0 %vm400_vm1, %v2287_v12  ;;  %v814_v12 = vstv %s2427_s18 }
  0xb2   : > { %2031 = vmatprep.mubr.msk.f32.mxu0 %vm400_vm1, %v2294_v13  ;;  %v2464_v13 = vld [vmem:[%s2957_s3 + $0x1] ss:$0 sm:$0xff]  ;;  %vm2613_vm5 = vcmp.eq.s32.totalorder %v814_v12, 1 }
  0xb5   : > { %2032 = vmatmul.mubr.msk.f32.gmra.mxu0 %vm400_vm1, %v2297_v14  ;;  %v2469_v14 = vld [vmem:[%s2957_s3 + $0x8] ss:$0 sm:$0xff] }
  0xb6   : > { %2034 = vmatprep.mubr.msk.f32.mxu0 %vm400_vm1, %v2304_v15 }
  0xb9   : > { %2035 = vmatmul.mubr.msk.f32.gmra.mxu0 %vm400_vm1, %v2307_v16 }
  0xba   : > { %2037 = vmatprep.mubr.msk.f32.mxu0 %vm400_vm1, %v2314_v17 }
  0xbd   : > { %2038 = vmatmul.mubr.msk.f32.gmra.mxu0 %vm400_vm1, %v2317_v18 }
  0xbe   : > { %2040 = vmatprep.mubr.msk.f32.mxu0 %vm400_vm1, %v2237_v1  ;;  %v2439_v1 = vld [vmem:[%s2957_s3 + $0xa] ss:$0 sm:$0xff] }
  0xc1   : > { %2041 = vmatmul.mubr.msk.f32.gmra.mxu0 %vm400_vm1, %v2248_v3 }
  0xc2   : > { %2043 = vmatprep.mubr.msk.f32.mxu0 %vm400_vm1, %v2240_v2 }
  0xc5   : > { %2044 = vmatmul.mubr.msk.f32.gmra.mxu0 %vm400_vm1, %v2251_v4 }
  0xc6   : > { %2046 = vmatprep.mubr.msk.f32.mxu0 %vm400_vm1, %v2260_v5 }
  0xc9   : > { %2047 = vmatmul.mubr.msk.f32.gmra.mxu0 %vm400_vm1, %v2263_v6 }
 0x14c   : > { %v1980_v45 = vpop.f32.mrf.mxu1 }
 0x14d   : > { %v559_v46 = vadd.f32 %v1980_v45, %v2415_v44 }
 0x14e   : > { %v553_v47 = vpop.f32.mrf.mxu1 }
 0x14f   : > { %v593_v48 = vmax.f32 %v559_v46, 0.0  ;;  %v554_v49 = vadd.f32 %v2415_v44, %v553_v47 }
 0x150   : > { %v1983_v50 = vpop.f32.mrf.mxu1 }
 0x151   : > { %611 = vst.msk [vmem:[#allocation2 + $0x99] sm:$0xff] %vm599_vm3, %v593_v48  ;;  %v592_v51 = vmax.f32 %v554_v49, 0.0  ;;  %v569_v52 = vadd.f32 %v1983_v50, %v2415_v44 }
 0x152   : > { %v563_v53 = vpop.f32.mrf.mxu1 }
 0x153   : > { %610 = vst.msk [vmem:[#allocation2 + $0x91] sm:$0xff] %vm599_vm3, %v592_v51  ;;  %v595_v54 = vmax.f32 %v569_v52, 0.0  ;;  %v564_v55 = vadd.f32 %v2415_v44, %v563_v53 }
 0x154   : > { %v1986_v56 = vpop.f32.mrf.mxu1 }
 0x155   : > { %613 = vst.msk [vmem:[#allocation2 + $0xb1] sm:$0xff] %vm599_vm3, %v595_v54  ;;  %v594_v57 = vmax.f32 %v564_v55, 0.0  ;;  %v579_v58 = vadd.f32 %v1986_v56, %v2415_v44 }
 0x156   : > { %v573_v59 = vpop.f32.mrf.mxu1 }
 0x157   : > { %612 = vst.msk [vmem:[#allocation2 + $0xa9] sm:$0xff] %vm599_vm3, %v594_v57  ;;  %v597_v60 = vmax.f32 %v579_v58, 0.0  ;;  %v574_v61 = vadd.f32 %v2415_v44, %v573_v59 }
 0x158   : > { %v1991_v0 = vpop.f32.mrf.mxu1  ;;  %v1204_v2 = vld [vmem:[#allocation2 + $0x99] sm:$0xff] }
 0x159   : > { %v2441_v3 = vld [vmem:[#allocation2 + $0x9a] sm:$0xff]  ;;  %615 = vst.msk [vmem:[#allocation2 + $0xc9] sm:$0xff] %vm599_vm3, %v597_v60  ;;  %v596_v4 = vmax.f32 %v574_v61, 0.0  ;;  %v706_v5 = vadd.f32 %v1991_v0, %v2415_v44  ;;  %v1965_v6 = vpop.f32.mrf.mxu0  ;;  %v2474_v21 = vmul.f32 %v2434_v63, %v1204_v2  ;;  %v2487_v27 = vmul.f32 %v2448_v7, %v1204_v2  ;;  %v2560_v61 = vld [vmem:[%s2957_s3 + $0x2] ss:$0 sm:$0xff] }
 0x15a   : > { %v509_v10 = vadd.f32 %v1965_v6, %v2415_v44  ;;  %v700_v11 = vpop.f32.mrf.mxu1  ;;  %v1149_v15 = vld [vmem:[#allocation2 + $0x90] sm:$0xff]  ;;  %v2478_v22 = vmul.f32 %v2439_v1, %v2441_v3  ;;  %v1150_v26 = vld [vmem:[#allocation2 + $0x98] sm:$0xff]  ;;  %v2491_v28 = vmul.f32 %v2453_v8, %v2441_v3  ;;  %v2499_v33 = vmul.f32 %v2464_v13, %v1204_v2 }
 0x15b   : > { %614 = vst.msk [vmem:[#allocation2 + $0xc1] sm:$0xff] %vm599_vm3, %v596_v4  ;;  %v710_v16 = vmax.f32 %v706_v5, 0.0  ;;  %v701_v17 = vadd.f32 %v2415_v44, %v700_v11  ;;  %v503_v18 = vpop.f32.mrf.mxu0  ;;  %v1203_v19 = vld [vmem:[#allocation2 + $0x91] sm:$0xff]  ;;  %2969 = vst [vmem:[#allocation3_spill] sm:$0xff] %v2474_v21  ;;  %v2496_v32 = vmul.f32 %v2469_v14, %v1149_v15  ;;  %v2522_v43 = vmul.f32 %v2469_v14, %v1150_v26 }
 0x15c   : > { %v1256_v20 = vld [vmem:[#allocation2 + $0x92] sm:$0xff]  ;;  %2970 = vst [vmem:[#allocation4_spill] sm:$0xff] %v2478_v22  ;;  %v583_v23 = vmax.f32 %v509_v10, 0.0  ;;  %v504_v24 = vadd.f32 %v2415_v44, %v503_v18  ;;  %2971 = vst [vmem:[#allocation5_spill] sm:$0xff] %v2487_v27  ;;  %v2510_v37 = vmul.f32 %v2434_v63, %v1203_v19  ;;  %v2525_v45 = vmul.f32 %v2484_v25, %v1149_v15 }
 0x15d   : > { %2972 = vst [vmem:[#allocation6_spill] sm:$0xff] %v2491_v28  ;;  %v715_v29 = vsel %vm2455_vm4, %v710_v16, 0.0  ;;  %v709_v30 = vmax.f32 %v701_v17, 0.0  ;;  %v1968_v31 = vpop.f32.mrf.mxu0  ;;  %v2513_v38 = vmul.f32 %v2439_v1, %v1256_v20  ;;  %2977 = vst [vmem:[#allocation11_spill] sm:$0xff] %v2522_v43  ;;  %v2528_v46 = vmul.f32 %v2448_v7, %v1203_v19  ;;  %v2543_v53 = vld [vmem:[#allocation2 + $0xb1] sm:$0xff] }
 0x15e   : > { %717 = vst.msk [vmem:[#allocation2 + $0x9] sm:$0xff] %vm599_vm3, %v715_v29  ;;  %601 = vst.msk [vmem:[#allocation2 + $0x21] sm:$0xff] %vm599_vm3, %v583_v23  ;;  %v582_v34 = vmax.f32 %v504_v24, 0.0  ;;  %v519_v35 = vadd.f32 %v1968_v31, %v2415_v44  ;;  %v2515_v39 = vld [vmem:[#allocation2 + $0xa8] sm:$0xff]  ;;  %v2532_v48 = vld [vmem:[#allocation2 + $0xb0] sm:$0xff]  ;;  %v2538_v51 = vmul.f32 %v2453_v8, %v1256_v20  ;;  %v2541_v52 = vmul.f32 %v2484_v25, %v1150_v26 }
 0x15f   : > { %2973 = vst [vmem:[#allocation7_spill] sm:$0xff] %v2510_v37  ;;  %2974 = vst [vmem:[#allocation8_spill] sm:$0xff] %v2513_v38  ;;  %v2517_v40 = vld [vmem:[#allocation2 + $0xa9] sm:$0xff]  ;;  %v714_v41 = vsel %vm2455_vm4, %v709_v30, 0.0  ;;  %v513_v42 = vpop.f32.mrf.mxu0  ;;  %v2547_v55 = vmul.f32 %v2469_v14, %v2515_v39  ;;  %v854_v57 = vmul.f32 %v2507_v36, %v1149_v15  ;;  %v907_v58 = vmul.f32 %v2464_v13, %v1203_v19 }
 0x160   : > { %2975 = vst [vmem:[#allocation9_spill] sm:$0xff] %v2515_v39  ;;  %2976 = vst [vmem:[#allocation10_spill] sm:$0xff] %v2517_v40  ;;  %v2530_v47 = vld [vmem:[#allocation2 + $0xaa] sm:$0xff]  ;;  %v585_v49 = vmax.f32 %v519_v35, 0.0  ;;  %v514_v50 = vadd.f32 %v2415_v44, %v513_v42  ;;  %v2551_v56 = vmul.f32 %v2434_v63, %v2517_v40  ;;  %v2568_v0 = vmul.f32 %v2469_v14, %v2532_v48 }
 0x161   : > { %2978 = vst [vmem:[#allocation12_spill] sm:$0xff] %v2530_v47  ;;  %2979 = vst [vmem:[#allocation13_spill] sm:$0xff] %v2532_v48  ;;  %v1971_v54 = vpop.f32.mrf.mxu0  ;;  %v2564_v62 = vmul.f32 %v2439_v1, %v2530_v47  ;;  %v2574_v5 = vmul.f32 %v2434_v63, %v2543_v53  ;;  %v923_v6 = vadd.f32 %v907_v58, %v854_v57 }
 0x162   : > { %716 = vst.msk [vmem:[#allocation2 + $0x1] sm:$0xff] %vm599_vm3, %v714_v41  ;;  %600 = vst.msk [vmem:[#allocation2 + $0x19] sm:$0xff] %vm599_vm3, %v582_v34  ;;  %v584_v59 = vmax.f32 %v514_v50, 0.0  ;;  %v529_v60 = vadd.f32 %v1971_v54, %v2415_v44  ;;  %v2570_v2 = vld [vmem:[#allocation2 + $0xc0] sm:$0xff]  ;;  %v960_v9 = vmul.f32 %v2560_v61, %v1256_v20  ;;  %v2579_v10 = vmul.f32 %v2484_v25, %v2515_v39 }
 0x163   : > { %2980 = vst [vmem:[#allocation14_spill] sm:$0xff] %v2538_v51  ;;  %2981 = vst [vmem:[#allocation15_spill] sm:$0xff] %v2547_v55  ;;  %v523_v4 = vpop.f32.mrf.mxu0  ;;  %v2585_v16 = vmul.f32 %v2448_v7, %v2517_v40  ;;  %v2589_v17 = vmul.f32 %v2453_v8, %v2530_v47  ;;  %v2595_v29 = vmul.f32 %v2469_v14, %v2570_v2 }
 0x164   : > { %2982 = vst [vmem:[#allocation16_spill] sm:$0xff] %v2551_v56  ;;  %603 = vst.msk [vmem:[#allocation2 + $0x39] sm:$0xff] %vm599_vm3, %v585_v49  ;;  %v587_v11 = vmax.f32 %v529_v60, 0.0  ;;  %v524_v15 = vadd.f32 %v2415_v44, %v523_v4  ;;  %v2591_v24 = vadd.f32 %v960_v9, %v923_v6  ;;  %v2598_v30 = vmul.f32 %v2507_v36, %v1150_v26 }
 0x165   : > { %2983 = vst [vmem:[#allocation17_spill] sm:$0xff] %v2564_v62  ;;  %2984 = vst [vmem:[#allocation18_spill] sm:$0xff] %v2568_v0  ;;  %v1974_v18 = vpop.f32.mrf.mxu0  ;;  %v875_v19 = vld [vmem:[#allocation2 + $0x9] sm:$0xff]  ;;  %v1035_v23 = vld [vmem:[#allocation2 + $0x21] sm:$0xff]  ;;  %v2602_v31 = vmul.f32 %v2560_v61, %v2441_v3  ;;  %v2609_v49 = vmul.f32 %v2484_v25, %v2532_v48 }
 0x166   : > { %2985 = vst [vmem:[#allocation19_spill] sm:$0xff] %v2570_v2  ;;  %2986 = vst [vmem:[#allocation20_spill] sm:$0xff] %v2574_v5  ;;  %v928_v20 = vld [vmem:[#allocation2 + $0xa] sm:$0xff]  ;;  %v586_v34 = vmax.f32 %v524_v15, 0.0  ;;  %v539_v35 = vadd.f32 %v1974_v18, %v2415_v44  ;;  %v896_v41 = vmul.f32 %v2464_v13, %v875_v19  ;;  %v1088_v42 = vld [vmem:[#allocation2 + $0x22] sm:$0xff]  ;;  %v2625_v4 = vmul.f32 %v2464_v13, %v1035_v23 }
 0x167   : > { %602 = vst.msk [vmem:[#allocation2 + $0x31] sm:$0xff] %vm599_vm3, %v584_v59  ;;  %2987 = vst [vmem:[#allocation21_spill] sm:$0xff] %v2595_v29  ;;  %v533_v50 = vpop.f32.mrf.mxu0  ;;  %v949_v58 = vmul.f32 %v2560_v61, %v928_v20  ;;  %v2619_v59 = vmul.f32 %v2448_v7, %v1035_v23  ;;  %v2622_v60 = vmul.f32 %v2453_v8, %v1088_v42 }
 0x168   : > { %605 = vst.msk [vmem:[#allocation2 + $0x51] sm:$0xff] %vm599_vm3, %v587_v11  ;;  %604 = vst.msk [vmem:[#allocation2 + $0x49] sm:$0xff] %vm599_vm3, %v586_v34  ;;  %v589_v12 = vmax.f32 %v539_v35, 0.0  ;;  %v534_v6 = vadd.f32 %v2415_v44, %v533_v50  ;;  %v2635_v34 = vmul.f32 %v2560_v61, %v1088_v42 }
 0x169   : > { %v821_v3 = vld [vmem:[#allocation2] sm:$0xff]  ;;  %v980_v15 = vld [vmem:[#allocation2 + $0x18] sm:$0xff]  ;;  %v1977_v20 = vpop.f32.mrf.mxu0  ;;  %v822_v62 = vld [vmem:[#allocation2 + $0x8] sm:$0xff] }
 0x16a   : > { %v874_v54 = vld [vmem:[#allocation2 + $0x1] sm:$0xff]  ;;  %v842_v9 = vmul.f32 %v2507_v36, %v821_v3  ;;  %v1034_v18 = vld [vmem:[#allocation2 + $0x19] sm:$0xff]  ;;  %v1002_v5 = vmul.f32 %v2484_v25, %v980_v15  ;;  %607 = vst.msk [vmem:[#allocation2 + $0x69] sm:$0xff] %vm599_vm3, %v589_v12  ;;  %v588_v35 = vmax.f32 %v534_v6, 0.0  ;;  %v549_v50 = vadd.f32 %v1977_v20, %v2415_v44 }
 0x16b   : > { %v927_v57 = vld [vmem:[#allocation2 + $0x2] sm:$0xff]  ;;  %v895_v11 = vmul.f32 %v2464_v13, %v874_v54  ;;  %v1087_v19 = vld [vmem:[#allocation2 + $0x1a] sm:$0xff]  ;;  %v1055_v23 = vmul.f32 %v2448_v7, %v1034_v18  ;;  %v843_v54 = vmul.f32 %v2507_v36, %v822_v62  ;;  %v543_v2 = vpop.f32.mrf.mxu0  ;;  %v844_v55 = vmul.f32 %v2507_v36, %v980_v15 }
 0x16c   : > { %v948_v48 = vmul.f32 %v2560_v61, %v927_v57  ;;  %v981_v0 = vld [vmem:[#allocation2 + $0x20] sm:$0xff]  ;;  %v1108_v47 = vmul.f32 %v2453_v8, %v1087_v19  ;;  %606 = vst.msk [vmem:[#allocation2 + $0x61] sm:$0xff] %vm599_vm3, %v588_v35  ;;  %v591_v62 = vmax.f32 %v549_v50, 0.0  ;;  %v950_v43 = vmul.f32 %v2560_v61, %v1087_v19 }
 0x16d   : > { %v911_v3 = vadd.f32 %v895_v11, %v842_v9  ;;  %v2640_v56 = vld [vmem:[#allocation2 + $0x39] sm:$0xff]  ;;  %v1003_v42 = vmul.f32 %v2484_v25, %v981_v0  ;;  %v544_v9 = vadd.f32 %v2415_v44, %v543_v2  ;;  %v1996_v40 = vpop.f32.mrf.mxu1  ;;  %v912_v27 = vadd.f32 %v896_v41, %v843_v54 }
 0x16e   : > { %v2642_v57 = vld [vmem:[#allocation2 + $0x3a] sm:$0xff]  ;;  %v2645_v22 = vld [vmem:[#allocation2 + $0x32] sm:$0xff]  ;;  %v2650_v12 = vmul.f32 %v2434_v63, %v2640_v56  ;;  %609 = vst.msk [vmem:[#allocation2 + $0x81] sm:$0xff] %vm599_vm3, %v591_v62  ;;  %v808_v50 = vadd.f32 %v1996_v40, %v2415_v44 }
 0x16f   : > { %v2654_v6 = vmul.f32 %v2439_v1, %v2642_v57  ;;  %v964_v11 = vadd.f32 %v948_v48, %v911_v3  ;;  %v1141_v20 = vld [vmem:[#allocation2 + $0x30] sm:$0xff]  ;;  %v1269_v39 = vmul.f32 %v2439_v1, %v2645_v22  ;;  %v590_v35 = vmax.f32 %v544_v9, 0.0  ;;  %v2665_v48 = vld [vmem:[#allocation2 + $0x38] sm:$0xff]  ;;  %v802_v15 = vpop.f32.mrf.mxu1  ;;  %v2674_v62 = vld [vmem:[#allocation2 + $0x48] sm:$0xff] }
 0x170   : > { %v1195_v28 = vld [vmem:[#allocation2 + $0x31] sm:$0xff]  ;;  %v1163_v21 = vmul.f32 %v2469_v14, %v1141_v20  ;;  %v897_v3 = vmul.f32 %v2464_v13, %v1034_v18  ;;  %v965_v51 = vadd.f32 %v949_v58, %v912_v27  ;;  %v1164_v29 = vmul.f32 %v2469_v14, %v2665_v48 }
 0x171   : > { %v1216_v38 = vmul.f32 %v2434_v63, %v1195_v28  ;;  %v1018_v2 = vadd.f32 %v1002_v5, %v964_v11  ;;  %v1004_v37 = vmul.f32 %v2484_v25, %v1141_v20  ;;  %608 = vst.msk [vmem:[#allocation2 + $0x79] sm:$0xff] %vm599_vm3, %v590_v35  ;;  %v812_v41 = vmax.f32 %v808_v50, 0.0  ;;  %v2676_v9 = vld [vmem:[#allocation2 + $0x4a] sm:$0xff] }
 0x172   : > { %v803_v54 = vadd.f32 %v2415_v44, %v802_v15  ;;  %v913_v5 = vadd.f32 %v897_v3, %v844_v55  ;;  %v1019_v18 = vadd.f32 %v1003_v42, %v965_v51  ;;  %v1057_v27 = vmul.f32 %v2448_v7, %v1195_v28  ;;  %v2685_v55 = vld [vmem:[#allocation2 + $0x49] sm:$0xff]  ;;  %v2707_v26 = vld [vmem:[#allocation2 + $0x51] sm:$0xff] }
 0x173   : > { %v1071_v40 = vadd.f32 %v1055_v23, %v1018_v2  ;;  %v1110_v58 = vmul.f32 %v2453_v8, %v2645_v22  ;;  %v1165_v19 = vmul.f32 %v2469_v14, %v2674_v62  ;;  %v817_v11 = vsel %vm2613_vm5, %v812_v41, 0.0 }
 0x174   : > { %v811_v35 = vmax.f32 %v803_v54, 0.0  ;;  %v966_v23 = vadd.f32 %v950_v43, %v913_v5  ;;  %820 = vst.msk [vmem:[#allocation2 + $0xe1] sm:$0xff] %vm599_vm3, %v817_v11  ;;  %v1072_v51 = vadd.f32 %v2619_v59, %v1019_v18  ;;  %v1218_v42 = vmul.f32 %v2434_v63, %v2685_v55 }
 0x175   : > { %v1124_v44 = vadd.f32 %v1108_v47, %v1071_v40  ;;  %v1271_v50 = vmul.f32 %v2439_v1, %v2676_v9  ;;  %v845_v2 = vmul.f32 %v2507_v36, %v981_v0  ;;  %v1005_v43 = vmul.f32 %v2484_v25, %v2665_v48  ;;  %v2705_v40 = vld [vmem:[#allocation2 + $0x50] sm:$0xff] }
 0x176   : > { %v816_v3 = vsel %vm2613_vm5, %v811_v35, 0.0  ;;  %v1020_v47 = vadd.f32 %v1004_v37, %v966_v23  ;;  %v1125_v59 = vadd.f32 %v2622_v60, %v1072_v51  ;;  %v1058_v54 = vmul.f32 %v2448_v7, %v2640_v56 }
 0x177   : > { %v1179_v15 = vadd.f32 %v1163_v21, %v1124_v44  ;;  %819 = vst.msk [vmem:[#allocation2 + $0xd9] sm:$0xff] %vm599_vm3, %v816_v3  ;;  %v914_v41 = vadd.f32 %v2625_v4, %v845_v2  ;;  %v1111_v0 = vmul.f32 %v2453_v8, %v2642_v57  ;;  %v2709_v21 = vld [vmem:[#allocation2 + $0x52] sm:$0xff]  ;;  %v1166_v18 = vmul.f32 %v2469_v14, %v2705_v40 }
 0x178   : > { %v1073_v5 = vadd.f32 %v1057_v27, %v1020_v47  ;;  %v1219_v60 = vmul.f32 %v2434_v63, %v2707_v26  ;;  %v1180_v4 = vadd.f32 %v1164_v29, %v1125_v59  ;;  %v846_v35 = vmul.f32 %v2507_v36, %v1141_v20 }
 0x179   : > { %v1232_v37 = vadd.f32 %v1216_v38, %v1179_v15  ;;  %v967_v11 = vadd.f32 %v2635_v34, %v914_v41  ;;  %v899_v44 = vmul.f32 %v2464_v13, %v1195_v28  ;;  %v1272_v2 = vmul.f32 %v2439_v1, %v2709_v21  ;;  %v2725_v34 = vld [vmem:[#allocation2 + $0x60] sm:$0xff] }
 0x17a   : > { %v1126_v51 = vadd.f32 %v1110_v58, %v1073_v5  ;;  %v952_v38 = vmul.f32 %v2560_v61, %v2645_v22  ;;  %v1233_v27 = vadd.f32 %v2650_v12, %v1180_v4  ;;  %v1006_v29 = vmul.f32 %v2484_v25, %v2674_v62  ;;  %v2734_v12 = vld [vmem:[#allocation2 + $0x61] sm:$0xff] }
 0x17b   : > { %v1285_v23 = vadd.f32 %v1269_v39, %v1232_v37  ;;  %v1021_v3 = vadd.f32 %v1005_v43, %v967_v11  ;;  %v915_v15 = vadd.f32 %v899_v44, %v846_v35  ;;  %v1059_v39 = vmul.f32 %v2448_v7, %v2685_v55  ;;  %v2736_v58 = vld [vmem:[#allocation2 + $0x62] sm:$0xff] }
 0x17c   : > { %v1181_v28 = vadd.f32 %v1165_v19, %v1126_v51  ;;  %v1112_v20 = vmul.f32 %v2453_v8, %v2676_v9  ;;  %v1167_v22 = vmul.f32 %v2469_v14, %v2725_v34  ;;  %v1286_v47 = vadd.f32 %v2654_v6, %v1233_v27  ;;  %v1253_v51 = vld [vmem:[#allocation2 + $0x6a] sm:$0xff] }
 0x17d   : > { %1999 = vmatprep.mubr.msk.f32.mxu1 %vm599_vm3, %v1285_v23  ;;  %v1074_v43 = vadd.f32 %v1058_v54, %v1021_v3  ;;  %v968_v59 = vadd.f32 %v952_v38, %v915_v15  ;;  %v1220_v19 = vmul.f32 %v2434_v63, %v2734_v12  ;;  %v847_v37 = vmul.f32 %v2507_v36, %v2665_v48  ;;  %v1146_v23 = vld [vmem:[#allocation2 + $0x68] sm:$0xff] }
 0x17e   : > { %v1234_v41 = vadd.f32 %v1218_v42, %v1181_v28  ;;  %v900_v5 = vmul.f32 %v2464_v13, %v2640_v56  ;;  %v953_v4 = vmul.f32 %v2560_v61, %v2642_v57  ;;  %2000 = vmatmul.mubr.msk.f32.vlgmr.msra.gmra.mxu1 %vm599_vm3, %v1286_v47  ;;  %v1273_v6 = vmul.f32 %v2439_v1, %v2736_v58  ;;  %v1200_v57 = vld [vmem:[#allocation2 + $0x69] sm:$0xff] }
 0x17f   : > { %v1127_v11 = vadd.f32 %v1111_v0, %v1074_v43  ;;  %v1022_v35 = vadd.f32 %v1006_v29, %v968_v59  ;;  %v1007_v54 = vmul.f32 %v2484_v25, %v2705_v40  ;;  %v1060_v48 = vmul.f32 %v2448_v7, %v2707_v26 }
 0x180   : > { %v1287_v42 = vadd.f32 %v1271_v50, %v1234_v41  ;;  %v916_v44 = vadd.f32 %v900_v5, %v847_v37  ;;  %v1113_v56 = vmul.f32 %v2453_v8, %v2709_v21  ;;  %v1168_v27 = vmul.f32 %v2469_v14, %v1146_v23  ;;  %v1147_v5 = vld [vmem:[#allocation2 + $0x78] sm:$0xff] }
 0x181   : > { %v1182_v38 = vadd.f32 %v1166_v18, %v1127_v11  ;;  %v1075_v0 = vadd.f32 %v1059_v39, %v1022_v35  ;;  %v1221_v3 = vmul.f32 %v2434_v63, %v1200_v57  ;;  %v848_v50 = vmul.f32 %v2507_v36, %v2674_v62 }
 0x182   : > { %2002 = vmatprep.mubr.msk.f32.mxu1 %vm599_vm3, %v1287_v42  ;;  %v969_v15 = vadd.f32 %v953_v4, %v916_v44  ;;  %v901_v29 = vmul.f32 %v2464_v13, %v2685_v55  ;;  %v954_v28 = vmul.f32 %v2560_v61, %v2676_v9  ;;  %v1274_v18 = vmul.f32 %v2439_v1, %v1253_v51  ;;  %v1201_v55 = vld [vmem:[#allocation2 + $0x79] sm:$0xff] }
 0x183   : > { %v1235_v47 = vadd.f32 %v1219_v60, %v1182_v38  ;;  %v1128_v43 = vadd.f32 %v1112_v20, %v1075_v0  ;;  %v1008_v39 = vmul.f32 %v2484_v25, %v2725_v34  ;;  %v1061_v37 = vmul.f32 %v2448_v7, %v2734_v12  ;;  %v1254_v4 = vld [vmem:[#allocation2 + $0x7a] sm:$0xff] }
 0x184   : > { %v1023_v59 = vadd.f32 %v1007_v54, %v969_v15  ;;  %v917_v41 = vadd.f32 %v901_v29, %v848_v50  ;;  %v1114_v62 = vmul.f32 %v2453_v8, %v2736_v58  ;;  %v1169_v60 = vmul.f32 %v2469_v14, %v1147_v5 }
 0x185   : > { %v1288_v11 = vadd.f32 %v1272_v2, %v1235_v47  ;;  %v1183_v9 = vadd.f32 %v1167_v22, %v1128_v43  ;;  %v1222_v20 = vmul.f32 %v2434_v63, %v1201_v55  ;;  %v849_v54 = vmul.f32 %v2507_v36, %v2705_v40  ;;  %v1202_v40 = vld [vmem:[#allocation2 + $0x81] sm:$0xff] }
 0x186   : > { %v1076_v35 = vadd.f32 %v1060_v48, %v1023_v59  ;;  %v970_v42 = vadd.f32 %v954_v28, %v917_v41  ;;  %v902_v44 = vmul.f32 %v2464_v13, %v2707_v26  ;;  %v1275_v0 = vmul.f32 %v2439_v1, %v1254_v4  ;;  %v1148_v28 = vld [vmem:[#allocation2 + $0x80] sm:$0xff] }
 0x187   : > { %2003 = vmatmul.mubr.msk.f32.gmra.mxu1 %vm599_vm3, %v1288_v11  ;;  %v1236_v38 = vadd.f32 %v1220_v19, %v1183_v9  ;;  %v955_v2 = vmul.f32 %v2560_v61, %v2709_v21  ;;  %v1009_v22 = vmul.f32 %v2484_v25, %v1146_v23  ;;  %v1062_v29 = vmul.f32 %v2448_v7, %v1200_v57  ;;  %v1255_v47 = vld [vmem:[#allocation2 + $0x82] sm:$0xff] }
 0x188   : > { %v1129_v15 = vadd.f32 %v1113_v56, %v1076_v35  ;;  %v1024_v50 = vadd.f32 %v1008_v39, %v970_v42  ;;  %v918_v48 = vadd.f32 %v902_v44, %v849_v54  ;;  %v1115_v26 = vmul.f32 %v2453_v8, %v1253_v51 }
 0x189   : > { %v1289_v43 = vadd.f32 %v1273_v6, %v1236_v38  ;;  %v1170_v19 = vmul.f32 %v2469_v14, %v1148_v28  ;;  %v1223_v59 = vmul.f32 %v2434_v63, %v1202_v40  ;;  %v850_v56 = vmul.f32 %v2507_v36, %v2725_v34 }
 0x18a   : > { %v1184_v41 = vadd.f32 %v1168_v27, %v1129_v15  ;;  %v1077_v11 = vadd.f32 %v1061_v37, %v1024_v50  ;;  %v971_v21 = vadd.f32 %v955_v2, %v918_v48  ;;  %v1276_v39 = vmul.f32 %v2439_v1, %v1255_v47 }
 0x18b   : > { %2005 = vmatprep.mubr.msk.f32.mxu1 %vm599_vm3, %v1289_v43  ;;  %v903_v9 = vmul.f32 %v2464_v13, %v2734_v12  ;;  %v956_v6 = vmul.f32 %v2560_v61, %v2736_v58  ;;  %v1010_v35 = vmul.f32 %v2484_v25, %v1147_v5  ;;  %v1063_v37 = vmul.f32 %v2448_v7, %v1201_v55 }
 0x18c   : > { %v1237_v42 = vadd.f32 %v1221_v3, %v1184_v41  ;;  %v1130_v54 = vadd.f32 %v1114_v62, %v1077_v11  ;;  %v1025_v27 = vadd.f32 %v1009_v22, %v971_v21  ;;  %v851_v34 = vmul.f32 %v2507_v36, %v1146_v23 }
 0x18d   : > { %v919_v44 = vadd.f32 %v903_v9, %v850_v56  ;;  %v904_v38 = vmul.f32 %v2464_v13, %v1200_v57  ;;  %v957_v2 = vmul.f32 %v2560_v61, %v1253_v51  ;;  %v1116_v48 = vmul.f32 %v2453_v8, %v1254_v4 }
 0x18e   : > { %v1290_v15 = vadd.f32 %v1274_v18, %v1237_v42  ;;  %v1185_v50 = vadd.f32 %v1169_v60, %v1130_v54  ;;  %v1078_v12 = vadd.f32 %v1062_v29, %v1025_v27  ;;  %v1011_v3 = vmul.f32 %v2484_v25, %v1148_v28 }
 0x18f   : > { %v972_v58 = vadd.f32 %v956_v6, %v919_v44  ;;  %v920_v43 = vadd.f32 %v904_v38, %v851_v34  ;;  %v1064_v62 = vmul.f32 %v2448_v7, %v1202_v40  ;;  %v852_v23 = vmul.f32 %v2507_v36, %v1147_v5 }
 0x190   : > { %2006 = vmatmul.mubr.msk.f32.gmra.mxu1 %vm599_vm3, %v1290_v15  ;;  %v1238_v22 = vadd.f32 %v1222_v20, %v1185_v50  ;;  %v1131_v41 = vadd.f32 %v1115_v26, %v1078_v12  ;;  %v905_v57 = vmul.f32 %v2464_v13, %v1201_v55  ;;  %v958_v60 = vmul.f32 %v2560_v61, %v1254_v4  ;;  %v1207_v4 = vld [vmem:[#allocation2 + $0xc1] sm:$0xff] }
 0x191   : > { %v1026_v51 = vadd.f32 %v1010_v35, %v972_v58  ;;  %v973_v18 = vadd.f32 %v957_v2, %v920_v43  ;;  %v853_v29 = vmul.f32 %v2507_v36, %v1148_v28  ;;  %v906_v9 = vmul.f32 %v2464_v13, %v1202_v40  ;;  %v2992_v50 = vld [vmem:[#allocation21_spill] sm:$0xff] }
 0x192   : > { %v1291_v11 = vadd.f32 %v1275_v0, %v1238_v22  ;;  %v1186_v21 = vadd.f32 %v1170_v19, %v1131_v41  ;;  %v921_v56 = vadd.f32 %v905_v57, %v852_v23  ;;  %v959_v20 = vmul.f32 %v2560_v61, %v1255_v47  ;;  %v2994_v43 = vld [vmem:[#allocation5_spill] sm:$0xff]  ;;  %v2997_v41 = vld [vmem:[#allocation3_spill] sm:$0xff] }
 0x193   : > { %v1079_v6 = vadd.f32 %v1063_v37, %v1026_v51  ;;  %v1027_v42 = vadd.f32 %v1011_v3, %v973_v18  ;;  %v1030_v5 = vadd.f32 %v2579_v10, %v2591_v24  ;;  %v922_v35 = vadd.f32 %v906_v9, %v853_v29  ;;  %v1259_v10 = vld [vmem:[#allocation2 + $0xb2] sm:$0xff]  ;;  %v1260_v57 = vld [vmem:[#allocation2 + $0xc2] sm:$0xff] }
 0x194   : > { %2008 = vmatprep.mubr.msk.f32.mxu1 %vm599_vm3, %v1291_v11  ;;  %v1239_v55 = vadd.f32 %v1223_v59, %v1186_v21  ;;  %v974_v26 = vadd.f32 %v958_v60, %v921_v56  ;;  %v924_v0 = vadd.f32 %v2499_v33, %v2598_v30  ;;  %v1117_v40 = vmul.f32 %v2453_v8, %v1255_v47  ;;  %v2998_v18 = vld [vmem:[#allocation10_spill] sm:$0xff]  ;;  %v2999_v29 = vld [vmem:[#allocation15_spill] sm:$0xff] }
 0x195   : > { %v1132_v28 = vadd.f32 %v1116_v48, %v1079_v6  ;;  %v1080_v19 = vadd.f32 %v1064_v62, %v1027_v42  ;;  %v1083_v54 = vadd.f32 %v2585_v16, %v1030_v5  ;;  %v975_v44 = vadd.f32 %v959_v20, %v922_v35  ;;  %v2993_v48 = vld [vmem:[#allocation14_spill] sm:$0xff]  ;;  %v2996_v62 = vld [vmem:[#allocation8_spill] sm:$0xff] }
 0x196   : > { %v1292_v27 = vadd.f32 %v1276_v39, %v1239_v55  ;;  %v1028_v37 = vadd.f32 %v2525_v45, %v974_v26  ;;  %v977_v24 = vadd.f32 %v2602_v31, %v924_v0  ;;  %v1228_v33 = vmul.f32 %v2434_v63, %v1207_v4  ;;  %v1154_v39 = vld [vmem:[#allocation2 + $0xc8] sm:$0xff]  ;;  %v2990_v31 = vld [vmem:[#allocation7_spill] sm:$0xff]  ;;  %v3001_v42 = vld [vmem:[#allocation4_spill] sm:$0xff] }
 0x197   : > { %v1187_v59 = vadd.f32 %v2496_v32, %v1132_v28  ;;  %v1133_v34 = vadd.f32 %v1117_v40, %v1080_v19  ;;  %v1136_v38 = vadd.f32 %v2589_v17, %v1083_v54  ;;  %v1029_v16 = vadd.f32 %v2541_v52, %v975_v44  ;;  %v2991_v32 = vld [vmem:[#allocation11_spill] sm:$0xff]  ;;  %v2995_v52 = vld [vmem:[#allocation9_spill] sm:$0xff]  ;;  %v3000_v21 = vld [vmem:[#allocation6_spill] sm:$0xff] }
 0x198   : > { %2009 = vmatmul.mubr.msk.f32.gmra.mxu1 %vm599_vm3, %v1292_v27  ;;  %v1081_v30 = vadd.f32 %v2528_v46, %v1028_v37  ;;  %v1031_v47 = vadd.f32 %v2609_v49, %v977_v24  ;;  %v1068_v45 = vmul.f32 %v2448_v7, %v2543_v53  ;;  %v1121_v12 = vmul.f32 %v2453_v8, %v1259_v10  ;;  %v1208_v5 = vld [vmem:[#allocation2 + $0xc9] sm:$0xff]  ;;  %v3002_v26 = vld [vmem:[#allocation12_spill] sm:$0xff] }
 0x199   : > { %v1240_v2 = vadd.f32 %v2990_v31, %v1187_v59  ;;  %v1188_v15 = vadd.f32 %v2991_v32, %v1133_v34  ;;  %v1191_v17 = vadd.f32 %v2992_v50, %v1136_v38  ;;  %v1082_v46 = vadd.f32 %v2994_v43, %v1029_v16  ;;  %v3003_v0 = vld [vmem:[#allocation19_spill] sm:$0xff]  ;;  %v3004_v19 = vld [vmem:[#allocation16_spill] sm:$0xff]  ;;  %v3005_v54 = vld [vmem:[#allocation18_spill] sm:$0xff] }
 0x19a   : > { %v1134_v58 = vadd.f32 %v2993_v48, %v1081_v30  ;;  %v1084_v3 = vadd.f32 %v1068_v45, %v1031_v47  ;;  %v856_v49 = vmul.f32 %v2507_v36, %v2995_v52  ;;  %v1176_v51 = vmul.f32 %v2469_v14, %v1154_v39  ;;  %v1155_v34 = vld [vmem:[#allocation2 + $0xd8] sm:$0xff]  ;;  %v3006_v38 = vld [vmem:[#allocation17_spill] sm:$0xff]  ;;  %v1261_v31 = vld [vmem:[#allocation2 + $0xca] sm:$0xff] }
 0x19b   : > { %v1293_v22 = vadd.f32 %v2996_v62, %v1240_v2  ;;  %v1241_v23 = vadd.f32 %v2997_v41, %v1188_v15  ;;  %v909_v60 = vmul.f32 %v2464_v13, %v2998_v18  ;;  %v1135_v56 = vadd.f32 %v3000_v21, %v1082_v46  ;;  %v3007_v30 = vld [vmem:[#allocation20_spill] sm:$0xff]  ;;  %v3008_v15 = vld [vmem:[#allocation13_spill] sm:$0xff] }
 0x19c   : > { %v1189_v11 = vadd.f32 %v2999_v29, %v1134_v58  ;;  %v1244_v9 = vadd.f32 %v1228_v33, %v1191_v17  ;;  %v1137_v6 = vadd.f32 %v1121_v12, %v1084_v3  ;;  %v962_v35 = vmul.f32 %v2560_v61, %v3002_v26  ;;  %v1209_v46 = vld [vmem:[#allocation2 + $0xd9] sm:$0xff] }
 0x19d   : > { %2011 = vmatprep.mubr.msk.f32.mxu1 %vm599_vm3, %v1293_v22  ;;  %v1294_v20 = vadd.f32 %v3001_v42, %v1241_v23  ;;  %v925_v55 = vadd.f32 %v909_v60, %v856_v49  ;;  %v1016_v28 = vmul.f32 %v2484_v25, %v3003_v0  ;;  %v1190_v27 = vadd.f32 %v3005_v54, %v1135_v56  ;;  %v1156_v23 = vld [vmem:[#allocation2 + $0xe0] sm:$0xff] }
 0x19e   : > { %v1242_v40 = vadd.f32 %v3004_v19, %v1189_v11  ;;  %v1281_v37 = vmul.f32 %v2439_v1, %v1260_v57  ;;  %v1192_v44 = vadd.f32 %v1176_v51, %v1137_v6  ;;  %v1280_v24 = vmul.f32 %v2439_v1, %v1259_v10  ;;  %v1263_v11 = vld [vmem:[#allocation2 + $0xe2] sm:$0xff] }
 0x19f   : > { %2012 = vmatmul.mubr.msk.f32.gmra.mxu1 %vm599_vm3, %v1294_v20  ;;  %v978_v59 = vadd.f32 %v962_v35, %v925_v55  ;;  %v1243_v16 = vadd.f32 %v3007_v30, %v1190_v27  ;;  %v1229_v45 = vmul.f32 %v2434_v63, %v1208_v5  ;;  %v1069_v32 = vmul.f32 %v2448_v7, %v1207_v4 }
 0x1a0   : > { %v1295_v33 = vadd.f32 %v3006_v38, %v1242_v40  ;;  %v1297_v47 = vadd.f32 %v1281_v37, %v1244_v9  ;;  %v857_v50 = vmul.f32 %v2507_v36, %v3008_v15  ;;  %v910_v17 = vmul.f32 %v2464_v13, %v2543_v53  ;;  %v1262_v13 = vld [vmem:[#allocation2 + $0xda] sm:$0xff] }
 0x1a1   : > { %v1032_v2 = vadd.f32 %v1016_v28, %v978_v59  ;;  %v1296_v12 = vadd.f32 %v1280_v24, %v1243_v16  ;;  %v1245_v48 = vadd.f32 %v1229_v45, %v1192_v44  ;;  %v1122_v58 = vmul.f32 %v2453_v8, %v1260_v57 }
 0x1a2   : > { %2014 = vmatprep.mubr.msk.f32.mxu1 %vm599_vm3, %v1295_v33  ;;  %v1177_v43 = vmul.f32 %v2469_v14, %v1155_v34  ;;  %v926_v52 = vadd.f32 %v910_v17, %v857_v50  ;;  %v963_v49 = vmul.f32 %v2560_v61, %v1259_v10  ;;  %v1017_v4 = vmul.f32 %v2484_v25, %v1154_v39  ;;  %v1210_v25 = vld [vmem:[#allocation2 + $0xe1] sm:$0xff] }
 0x1a3   : > { %v1085_v3 = vadd.f32 %v1069_v32, %v1032_v2  ;;  %2015 = vmatmul.mubr.msk.f32.gmra.mxu1 %vm599_vm3, %v1296_v12  ;;  %v1282_v36 = vmul.f32 %v2439_v1, %v1261_v31  ;;  %v1230_v62 = vmul.f32 %v2434_v63, %v1209_v46  ;;  %v1283_v51 = vmul.f32 %v2439_v1, %v1262_v13 }
 0x1a4   : > { %2017 = vmatprep.mubr.msk.f32.mxu1 %vm599_vm3, %v1297_v47  ;;  %v979_v22 = vadd.f32 %v963_v49, %v926_v52  ;;  %v1070_v61 = vmul.f32 %v2448_v7, %v1208_v5  ;;  %v1123_v60 = vmul.f32 %v2453_v8, %v1261_v31  ;;  %v1178_v29 = vmul.f32 %v2469_v14, %v1156_v23  ;;  %v2027_v5 = vpop.f32.mrf.mxu0  ;;  %v2883_v8 = vld [vmem:[%s2960_s6] ss:$0 sm:$0xff] }
 0x1a5   : > { %v1138_v53 = vadd.f32 %v1122_v58, %v1085_v3  ;;  %v1298_v41 = vadd.f32 %v1282_v36, %v1245_v48  ;;  %v1231_v9 = vmul.f32 %v2434_v63, %v1210_v25  ;;  %v1284_v7 = vmul.f32 %v2439_v1, %v1263_v11 }
 0x1a6   : > { %v1033_v18 = vadd.f32 %v1017_v4, %v979_v22  ;;  %v1620_v14 = vpop.f32.mrf.mxu0 }
 0x1a7   : > { %v1193_v57 = vadd.f32 %v1177_v43, %v1138_v53  ;;  %2018 = vmatmul.mubr.msk.f32.gmra.mxu1 %vm599_vm3, %v1298_v41 }
 0x1a8   : > { %v1086_v39 = vadd.f32 %v1070_v61, %v1033_v18  ;;  %v2030_v1 = vpop.f32.mrf.mxu0 }
 0x1a9   : > { %v1246_v10 = vadd.f32 %v1230_v62, %v1193_v57 }
 0x1aa   : > { %v1139_v56 = vadd.f32 %v1123_v60, %v1086_v39  ;;  %v1630_v54 = vpop.f32.mrf.mxu0 }
 0x1ab   : > { %v1299_v21 = vadd.f32 %v1283_v51, %v1246_v10 }
 0x1ac   : > { %v1194_v6 = vadd.f32 %v1178_v29, %v1139_v56  ;;  %v2033_v34 = vpop.f32.mrf.mxu0 }
 0x1ad   : > { %2020 = vmatprep.mubr.msk.f32.mxu1 %vm599_vm3, %v1299_v21 }
 0x1ae   : > { %v1247_v42 = vadd.f32 %v1231_v9, %v1194_v6  ;;  %v1640_v16 = vpop.f32.mrf.mxu0 }
 0x1b0   : > { %v1300_v20 = vadd.f32 %v1284_v7, %v1247_v42  ;;  %v2036_v2 = vpop.f32.mrf.mxu0 }
 0x1b2   : > { %2021 = vmatmul.mubr.msk.f32.gmra.mxu1 %vm599_vm3, %v1300_v20  ;;  %v1650_v12 = vpop.f32.mrf.mxu0 }
 0x1b4   : > { %v2039_v3 = vpop.f32.mrf.mxu0 }
 0x1b6   : > { %v1660_v13 = vpop.f32.mrf.mxu0 }
 0x1b8   : > { %v2042_v51 = vpop.f32.mrf.mxu0 }
 0x1ba   : > { %v1670_v29 = vpop.f32.mrf.mxu0 }
 0x1bc   : > { %v2045_v20 = vpop.f32.mrf.mxu0 }
 0x23e   : > { %v2001_v55 = vpop.f32.mrf.mxu1 }
 0x23f   : > { %v1429_v63 = vadd.f32 %v2001_v55, %v2883_v8 }
 0x240   : > { %v1423_v26 = vpop.f32.mrf.mxu1 }
 0x241   : > { %v1503_v35 = vmax.f32 %v1429_v63, 0.0  ;;  %v1424_v0 = vadd.f32 %v2883_v8, %v1423_v26 }
 0x243   : > { %v1502_v28 = vmax.f32 %v1424_v0, 0.0  ;;  %v1626_v19 = vadd.f32 %v2027_v5, %v1503_v35  ;;  %v1680_v35 = vpop.f32.mrf.mxu0 }
 0x245   : > { %1700 = vst.msk [vmem:[%s2891_s8 + $0x8] sm:$0xff] %vm599_vm3, %v1626_v19  ;;  %v1621_v40 = vadd.f32 %v1620_v14, %v1502_v28 }
 0x247   : > { %v2004_v27 = vpop.f32.mrf.mxu1  ;;  %1699 = vst.msk [vmem:[%s2891_s8] sm:$0xff] %vm599_vm3, %v1621_v40  ;;  %v2048_v40 = vpop.f32.mrf.mxu0 }
 0x248   : > { %v1439_v37 = vadd.f32 %v2004_v27, %v2883_v8 }
 0x249   : > { %v1433_v44 = vpop.f32.mrf.mxu1 }
 0x24a   : > { %v1505_v24 = vmax.f32 %v1439_v37, 0.0  ;;  %v1434_v59 = vadd.f32 %v2883_v8, %v1433_v44 }
 0x24c   : > { %v1504_v38 = vmax.f32 %v1434_v59, 0.0  ;;  %v1636_v33 = vadd.f32 %v2030_v1, %v1505_v24  ;;  %v1690_v24 = vpop.f32.mrf.mxu0 }
 0x24e   : > { %1702 = vst.msk [vmem:[%s2891_s8 + $0x18] sm:$0xff] %vm599_vm3, %v1636_v33  ;;  %v1631_v30 = vadd.f32 %v1630_v54, %v1504_v38 }
 0x250   : > { %v2007_v47 = vpop.f32.mrf.mxu1  ;;  %1701 = vst.msk [vmem:[%s2891_s8 + $0x10] sm:$0xff] %vm599_vm3, %v1631_v30 }
 0x251   : > { %v1449_v45 = vadd.f32 %v2007_v47, %v2883_v8 }
 0x252   : > { %v1443_v31 = vpop.f32.mrf.mxu1 }
 0x253   : > { %v1507_v32 = vmax.f32 %v1449_v45, 0.0  ;;  %v1444_v15 = vadd.f32 %v2883_v8, %v1443_v31 }
 0x255   : > { %v1506_v50 = vmax.f32 %v1444_v15, 0.0  ;;  %v1646_v17 = vadd.f32 %v2033_v34, %v1507_v32 }
 0x257   : > { %1704 = vst.msk [vmem:[%s2891_s8 + $0x28] sm:$0xff] %vm599_vm3, %v1646_v17  ;;  %v1641_v48 = vadd.f32 %v1640_v16, %v1506_v50 }
 0x258   : > { %v2010_v58 = vpop.f32.mrf.mxu1 }
 0x259   : > { %v1459_v43 = vadd.f32 %v2010_v58, %v2883_v8  ;;  %1703 = vst.msk [vmem:[%s2891_s8 + $0x20] sm:$0xff] %vm599_vm3, %v1641_v48 }
 0x25a   : > { %v1453_v46 = vpop.f32.mrf.mxu1 }
 0x25b   : > { %v1509_v52 = vmax.f32 %v1459_v43, 0.0  ;;  %v1454_v49 = vadd.f32 %v2883_v8, %v1453_v46 }
 0x25d   : > { %v1508_v4 = vmax.f32 %v1454_v49, 0.0  ;;  %v1656_v36 = vadd.f32 %v2036_v2, %v1509_v52 }
 0x25f   : > { %1706 = vst.msk [vmem:[%s2891_s8 + $0x38] sm:$0xff] %vm599_vm3, %v1656_v36  ;;  %v2013_v53 = vpop.f32.mrf.mxu1  ;;  %v1651_v62 = vadd.f32 %v1650_v12, %v1508_v4 }
 0x260   : > { %v1469_v22 = vadd.f32 %v2013_v53, %v2883_v8 }
 0x261   : > { %1705 = vst.msk [vmem:[%s2891_s8 + $0x30] sm:$0xff] %vm599_vm3, %v1651_v62  ;;  %v1463_v41 = vpop.f32.mrf.mxu1 }
 0x262   : > { %v1511_v23 = vmax.f32 %v1469_v22, 0.0  ;;  %v1464_v57 = vadd.f32 %v2883_v8, %v1463_v41 }
 0x263   : > { %v2016_v25 = vpop.f32.mrf.mxu1 }
 0x264   : > { %v1510_v18 = vmax.f32 %v1464_v57, 0.0  ;;  %v1666_v61 = vadd.f32 %v2039_v3, %v1511_v23  ;;  %v1479_v10 = vadd.f32 %v2016_v25, %v2883_v8 }
 0x265   : > { %v1473_v60 = vpop.f32.mrf.mxu1 }
 0x266   : > { %1708 = vst.msk [vmem:[%s2891_s8 + $0x48] sm:$0xff] %vm599_vm3, %v1666_v61  ;;  %v1661_v39 = vadd.f32 %v1660_v13, %v1510_v18  ;;  %v1513_v11 = vmax.f32 %v1479_v10, 0.0  ;;  %v1474_v21 = vadd.f32 %v2883_v8, %v1473_v60 }
 0x267   : > { %v2019_v56 = vpop.f32.mrf.mxu1 }
 0x268   : > { %1707 = vst.msk [vmem:[%s2891_s8 + $0x40] sm:$0xff] %vm599_vm3, %v1661_v39  ;;  %v1512_v9 = vmax.f32 %v1474_v21, 0.0  ;;  %v1676_v6 = vadd.f32 %v2042_v51, %v1513_v11  ;;  %v1489_v7 = vadd.f32 %v2019_v56, %v2883_v8 }
 0x269   : > { %v1483_v42 = vpop.f32.mrf.mxu1 }
 0x26a   : > { %1710 = vst.msk [vmem:[%s2891_s8 + $0x58] sm:$0xff] %vm599_vm3, %v1676_v6  ;;  %v1515_v5 = vmax.f32 %v1489_v7, 0.0  ;;  %v1671_v14 = vadd.f32 %v1670_v29, %v1512_v9  ;;  %v1484_v55 = vadd.f32 %v2883_v8, %v1483_v42 }
 0x26c   : > { %1709 = vst.msk [vmem:[%s2891_s8 + $0x50] sm:$0xff] %vm599_vm3, %v1671_v14  ;;  %v1514_v63 = vmax.f32 %v1484_v55, 0.0  ;;  %v1686_v26 = vadd.f32 %v2045_v20, %v1515_v5 }
 0x26e   : > { %1712 = vst.msk [vmem:[%s2891_s8 + $0x68] sm:$0xff] %vm599_vm3, %v1686_v26  ;;  %v1681_v0 = vadd.f32 %v1680_v35, %v1514_v63 }
 0x270   : > { %1711 = vst.msk [vmem:[%s2891_s8 + $0x60] sm:$0xff] %vm599_vm3, %v1681_v0 }
 0x272   : > { %v2022_v1 = vpop.f32.mrf.mxu1 }
 0x273   : > { %v1499_v28 = vadd.f32 %v2022_v1, %v2883_v8 }
 0x274   : > { %v1493_v19 = vpop.f32.mrf.mxu1 }
 0x275   : > { %v1517_v54 = vmax.f32 %v1499_v28, 0.0  ;;  %v1494_v27 = vadd.f32 %v2883_v8, %v1493_v19 }
 0x277   : > { %v1516_v37 = vmax.f32 %v1494_v27, 0.0  ;;  %v1696_v44 = vadd.f32 %v2048_v40, %v1517_v54 }
 0x279   : > { %1714 = vst.msk [vmem:[%s2891_s8 + $0x78] sm:$0xff] %vm599_vm3, %v1696_v44  ;;  %v1691_v59 = vadd.f32 %v1690_v24, %v1516_v37 }
 0x27b   : > { %1713 = vst.msk [vmem:[%s2891_s8 + $0x70] sm:$0xff] %vm599_vm3, %v1691_v59 }
 0x27c PF: > { %s17_s28 = sadd.s32 1, %s2131_s28   ;;  %s3009_s24 = smov %s2123_s26 }
 0x27d   : > { %p14_p11 = scmp.ge.s32.totalorder %s17_s28, 6   ;;  %s3010_s25 = smov %s2127_s27 }
 0x27e   : > { %s3011_s26 = smov %s3014_s29  ;;  %s3012_s27 = smov %s3018_s30 }
 0x27f   :  { %16 = sbr.rel (!%p14_p11) target bundleno = 3 (0x3), region = 86 }

</bundles_post_ra>
